<compile_context>
chip_gen: v7x
topology: tpu7x:2x2x1
jax: 0.10.0
libtpu: 0.0.40
codegen_flags: <defaults>
</compile_context>

<pallas_src>
import numpy as np
import jax
import jax.numpy as jnp
from jax.experimental import pallas as pl
from jax.experimental.pallas import tpu as pltpu

EPS = 1e-6


# ---------------------------------------------------------------------------
# Host-side constant construction
# ---------------------------------------------------------------------------
def _fused_dft_operators(H, W, HKp):
    """Dense operators implementing rfft2/irfft2 (norm='ortho', torch semantics).

    Forward:  [Xr | Xi](m,k) = sum_{h,w} x[h,w] * F*(h*W+w, m*K+k)
    Inverse:  x[h,w] = sum_{m,k} Zr*Gr + Zi*Gi   (imag of DC/Nyquist discarded,
                                                  exactly like torch.fft.irfft2)
    Frequency axis (H*K) is zero-padded to HKp (multiple of 128) so all kernel
    intermediates are lane-dense.  Returned in bf16 (MXU inputs); accumulation
    stays f32 in the kernel.
    """
    assert W % 2 == 0, "even width assumed for Nyquist handling"
    K = W // 2 + 1
    HW, HK = H * W, H * K
    scale = 1.0 / np.sqrt(HW)

    h = np.arange(H); w = np.arange(W); m = np.arange(H); k = np.arange(K)

    # Forward: angle = 2*pi*(m*h/H + k*w/W); Xr = cos, Xi = -sin.
    alpha_f = 2.0 * np.pi * np.outer(h, m) / H                     # (H, Hm)
    beta_f = 2.0 * np.pi * np.outer(w, k) / W                      # (W, K)
    ang = alpha_f[:, None, :, None] + beta_f[None, :, None, :]     # (H, W, Hm, K)
    Fr = (np.cos(ang) * scale).reshape(HW, HK)
    Fi = (-np.sin(ang) * scale).reshape(HW, HK)

    # Inverse (ifft along H, then irfft along W):
    #   x[h,w] = sum_{m,k} Zr*(ck*ca*cb - sk*sa*sb) + Zi*(-ck*sa*cb - sk*ca*sb)
    ck = np.where((k == 0) | (k == K - 1), 1.0, 2.0)               # DC/Nyq once
    sk = np.where((k == 0) | (k == K - 1), 0.0, 2.0)               # imag ignored
    alpha_i = 2.0 * np.pi * np.outer(m, h) / H                     # (Hm, H)
    beta_i = 2.0 * np.pi * np.outer(k, w) / W                      # (K, W)
    ca, sa = np.cos(alpha_i), np.sin(alpha_i)                      # [m, h]
    cb, sb = np.cos(beta_i), np.sin(beta_i)                        # [k, w]
    ckb = ck[None, :, None, None]
    skb = sk[None, :, None, None]
    ca4, sa4 = ca[:, None, :, None], sa[:, None, :, None]          # (Hm,1,H,1)
    cb4, sb4 = cb[None, :, None, :], sb[None, :, None, :]          # (1,K,1,W)
    Gr = ((ckb * ca4 * cb4 - skb * sa4 * sb4) * scale).reshape(HK, HW)
    Gi = ((-ckb * sa4 * cb4 - skb * ca4 * sb4) * scale).reshape(HK, HW)

    # Zero-pad frequency axis HK -> HKp (padded freqs contribute exact zeros).
    pad = HKp - HK
    Fr = np.pad(Fr, ((0, 0), (0, pad)))
    Fi = np.pad(Fi, ((0, 0), (0, pad)))
    Gr = np.pad(Gr, ((0, pad), (0, 0)))
    Gi = np.pad(Gi, ((0, pad), (0, 0)))

    return (jnp.asarray(Fr, jnp.bfloat16), jnp.asarray(Fi, jnp.bfloat16),
            jnp.asarray(Gr, jnp.bfloat16), jnp.asarray(Gi, jnp.bfloat16))


def _conv_tap_masks(H, W):
    """(9, H*W) boundary masks for the 3x3 padding=1 conv in flattened layout."""
    flat = np.arange(H * W)
    hh, ww = flat // W, flat % W
    masks = []
    for kh in range(3):
        for kw in range(3):
            dh, dw = kh - 1, kw - 1
            valid = ((hh + dh >= 0) & (hh + dh < H)
                     & (ww + dw >= 0) & (ww + dw < W))
            masks.append(valid.astype(np.float32))
    return jnp.asarray(np.stack(masks, axis=0))


# ---------------------------------------------------------------------------
# Pallas kernel (one batch element per grid step, everything lane-dense)
# ---------------------------------------------------------------------------
def _make_glf_kernel(H, W, C):
    HW = H * W
    offsets = [(kh - 1, kw - 1) for kh in range(3) for kw in range(3)]

    def kernel(x_ref, pre_g_ref, pre_b_ref, dw_ref, mask_ref,
               fr_ref, fi_ref, gr_ref, gi_ref, wr_ref, wi_ref,
               pg_e_ref, pb_e_ref, pg_o_ref, pb_o_ref, o_ref):
        x = x_ref[0].astype(jnp.float32)                     # (2C, HW)
        dim = 2 * C

        # ---- pre_norm: channels-first LayerNorm (reduce over channel axis) ----
        u = jnp.mean(x, axis=0, keepdims=True)
        var = jnp.mean((x - u) ** 2, axis=0, keepdims=True)
        xn = (x - u) * jax.lax.rsqrt(var + EPS)
        xn = pre_g_ref[...] * xn + pre_b_ref[...]

        x1 = xn[:C]                                          # conv branch  (C, HW)
        x2 = xn[C:]                                          # spectral branch

        # ---- depthwise 3x3 conv, padding=1, on the flattened lane axis ----
        dw_all = dw_ref[...]                                 # (C, 9)
        masks = mask_ref[...]                                # (9, HW)
        acc = jnp.zeros((C, HW), jnp.float32)
        for t, (dh, dwv) in enumerate(offsets):
            shift = dh * W + dwv
            shifted = x1 if shift == 0 else jnp.roll(x1, -shift, axis=1)
            acc = acc + dw_all[:, t][:, None] * (shifted * masks[t][None, :])
        x1c = acc

        # ---- fused rfft2 -> complex weight -> irfft2 (ortho) on the MXU ----
        x2b = x2.astype(jnp.bfloat16)
        xr = jnp.dot(x2b, fr_ref[...], preferred_element_type=jnp.float32)  # (C, HKp)
        xi = jnp.dot(x2b, fi_ref[...], preferred_element_type=jnp.float32)
        wr = wr_ref[...]                                     # (C, HKp) f32
        wi = wi_ref[...]
        zr = xr * wr - xi * wi
        zi = xr * wi + xi * wr
        x2o = (jnp.dot(zr.astype(jnp.bfloat16), gr_ref[...],
                       preferred_element_type=jnp.float32)
               + jnp.dot(zi.astype(jnp.bfloat16), gi_ref[...],
                         preferred_element_type=jnp.float32))                # (C, HW)

        # ---- post_norm: stats over all 2C channels (permutation invariant) ----
        mu = (jnp.sum(x1c, axis=0, keepdims=True)
              + jnp.sum(x2o, axis=0, keepdims=True)) / dim
        var2 = (jnp.sum((x1c - mu) ** 2, axis=0, keepdims=True)
                + jnp.sum((x2o - mu) ** 2, axis=0, keepdims=True)) / dim
        inv = jax.lax.rsqrt(var2 + EPS)

        y1 = pg_e_ref[...] * ((x1c - mu) * inv) + pb_e_ref[...]   # -> channels 2c
        y2 = pg_o_ref[...] * ((x2o - mu) * inv) + pb_o_ref[...]   # -> channels 2c+1

        # Interleave is realised by a free host-side reshape of (B, C, 2*HW):
        # lanes [0, HW) of row c -> output channel 2c, lanes [HW, 2HW) -> 2c+1.
        o_ref[0, :, :HW] = y1.astype(o_ref.dtype)
        o_ref[0, :, HW:] = y2.astype(o_ref.dtype)

    return kernel


# ---------------------------------------------------------------------------
# Wrapper
# ---------------------------------------------------------------------------
def global_local_filter(x, params):
    pre_g, pre_b, dw_w, cw, post_g, post_b = params
    B, dim, H, W = x.shape
    C = dim // 2
    K = W // 2 + 1
    HW, HK = H * W, H * K
    HKp = max(128, ((HK + 127) // 128) * 128)                # lane-dense freq axis
    assert cw.shape == (C, H, K, 2), "complex_weight must match rfft2 grid"

    Fr, Fi, Gr, Gi = _fused_dft_operators(H, W, HKp)
    tap_mask = _conv_tap_masks(H, W)                         # (9, HW)

    wr = cw[..., 0].reshape(C, HK).astype(jnp.float32)
    wi = cw[..., 1].reshape(C, HK).astype(jnp.float32)
    wr = jnp.pad(wr, ((0, 0), (0, HKp - HK)))
    wi = jnp.pad(wi, ((0, 0), (0, HKp - HK)))
    dw_tap = dw_w.reshape(C, 9).astype(jnp.float32)

    pre_g2 = pre_g.astype(jnp.float32)[:, None]
    pre_b2 = pre_b.astype(jnp.float32)[:, None]
    pg_e = post_g.astype(jnp.float32)[0::2][:, None]
    pb_e = post_b.astype(jnp.float32)[0::2][:, None]
    pg_o = post_g.astype(jnp.float32)[1::2][:, None]
    pb_o = post_b.astype(jnp.float32)[1::2][:, None]

    consts = [pre_g2, pre_b2, dw_tap, tap_mask, Fr, Fi, Gr, Gi, wr, wi,
              pg_e, pb_e, pg_o, pb_o]

    def const_spec(a):
        nd = a.ndim
        return pl.BlockSpec(a.shape, lambda b, _nd=nd: (0,) * _nd)

    # Lane-dense input: (B, dim, H*W); no wrapper-side dtype cast (cast in-kernel).
    x_flat = x.reshape(B, dim, HW)

    kernel = _make_glf_kernel(H, W, C)

    out = pl.pallas_call(
        kernel,
        out_shape=jax.ShapeDtypeStruct((B, C, 2 * HW), jnp.float32),
        grid_spec=pltpu.PrefetchScalarGridSpec(
            num_scalar_prefetch=0,
            grid=(B,),
            in_specs=([pl.BlockSpec((1, dim, HW), lambda b: (b, 0, 0))]
                      + [const_spec(a) for a in consts]),
            out_specs=pl.BlockSpec((1, C, 2 * HW), lambda b: (b, 0, 0)),
        ),
        compiler_params=pltpu.CompilerParams(dimension_semantics=("parallel",)),
    )(x_flat, *consts)

    # (B, C, 2*H*W) -> (B, 2C, H, W): pure metadata reshape; channel 2c comes
    # from the conv branch, 2c+1 from the spectral branch (PyTorch interleave).
    return out.reshape(B, dim, H, W)


# ---------------------------------------------------------------------------
# Plain-JAX reference (uses jnp.fft, matches torch.fft semantics) — validation
# ---------------------------------------------------------------------------
def reference_forward(x, params):
    pre_g, pre_b, dw_w, cw, post_g, post_b = params
    hp = jax.lax.Precision.HIGHEST
    x = x.astype(jnp.float32)

    u = x.mean(1, keepdims=True)
    s = ((x - u) ** 2).mean(1, keepdims=True)
    xn = (x - u) / jnp.sqrt(s + EPS)
    xn = pre_g[None, :, None, None] * xn + pre_b[None, :, None, None]
    C = xn.shape[1] // 2
    x1, x2 = xn[:, :C], xn[:, C:]

    x1 = jax.lax.conv_general_dilated(
        x1, dw_w[:, None].astype(jnp.float32), (1, 1), "SAME",
        dimension_numbers=("NCHW", "OIHW", "NCHW"),
        feature_group_count=C, precision=hp)

    X = jnp.fft.rfft2(x2, axes=(2, 3), norm="ortho")
    weight = cw[..., 0] + 1j * cw[..., 1]
    X = X * weight[None]
    x2o = jnp.fft.irfft2(X, s=x2.shape[2:], axes=(2, 3), norm="ortho")

    y = jnp.concatenate([x1[:, :, None], x2o[:, :, None]], axis=2)
    y = y.reshape(x.shape)
    u2 = y.mean(1, keepdims=True)
    s2 = ((y - u2) ** 2).mean(1, keepdims=True)
    yn = (y - u2) / jnp.sqrt(s2 + EPS)
    return post_g[None, :, None, None] * yn + post_b[None, :, None, None]


# ---------------------------------------------------------------------------
if __name__ == "__main__":
    key = jax.random.PRNGKey(0)
    kx, kw1, kw2, kg1, kb1, kg2, kb2 = jax.random.split(key, 7)

    B, dim, H, W = 2, 8, 16, 16          # GlobalLocalFilter(dim=8, h=16, w=9)
    C, K = dim // 2, W // 2 + 1

    x = jax.random.normal(kx, (B, dim, H, W), jnp.float32)
    # nn.Conv2d(dim//2, dim//2, 3, groups=dim//2, bias=False) weight (C,1,3,3) -> (C,3,3)
    dw_w = jax.random.normal(kw1, (C, 3, 3), jnp.float32) * 0.2
    # complex_weight: (dim//2, h, w, 2), built at h=H, w=W//2+1 (matches rfft2 grid)
    cw = jax.random.normal(kw2, (C, H, K, 2), jnp.float32) * 0.02
    pre_g = jnp.ones((dim,), jnp.float32) + 0.05 * jax.random.normal(kg1, (dim,), jnp.float32)
    pre_b = 0.05 * jax.random.normal(kb1, (dim,), jnp.float32)
    post_g = jnp.ones((dim,), jnp.float32) + 0.05 * jax.random.normal(kg2, (dim,), jnp.float32)
    post_b = 0.05 * jax.random.normal(kb2, (dim,), jnp.float32)
    params = (pre_g, pre_b, dw_w, cw, post_g, post_b)

    out = jax.block_until_ready(global_local_filter(x, params))

    ref = reference_forward(x, params)
    # bf16 MXU inputs (f32 accumulation) on the spectral branch -> ~1e-3 noise.
    np.testing.assert_allclose(np.asarray(out), np.asarray(ref), atol=5e-3, rtol=5e-3)
    print("KERNEL_OK")
</pallas_src>

<mosaic_0001>
module attributes {stable_mosaic.version = 11 : i64} {
  func.func @kernel(%arg0: i32, %arg1: memref<1x8x256xf32, #tpu.memory_space<vmem>>, %arg2: memref<8x1xf32, #tpu.memory_space<vmem>>, %arg3: memref<8x1xf32, #tpu.memory_space<vmem>>, %arg4: memref<4x9xf32, #tpu.memory_space<vmem>>, %arg5: memref<9x256xf32, #tpu.memory_space<vmem>>, %arg6: memref<256x256xbf16, #tpu.memory_space<vmem>>, %arg7: memref<256x256xbf16, #tpu.memory_space<vmem>>, %arg8: memref<256x256xbf16, #tpu.memory_space<vmem>>, %arg9: memref<256x256xbf16, #tpu.memory_space<vmem>>, %arg10: memref<4x256xf32, #tpu.memory_space<vmem>>, %arg11: memref<4x256xf32, #tpu.memory_space<vmem>>, %arg12: memref<4x1xf32, #tpu.memory_space<vmem>>, %arg13: memref<4x1xf32, #tpu.memory_space<vmem>>, %arg14: memref<4x1xf32, #tpu.memory_space<vmem>>, %arg15: memref<4x1xf32, #tpu.memory_space<vmem>>, %arg16: memref<1x4x512xf32, #tpu.memory_space<vmem>>) attributes {dimension_semantics = [#tpu.dimension_semantics<parallel>], iteration_bounds = array<i64: 2>, scalar_prefetch = 0 : i64, scratch_operands = 0 : i64, tpu.core_type = #tpu.core_type<tc>, window_params = [{transform_indices = @transform_0, window_bounds = array<i64: 1, 8, 256>}, {pipeline_mode = #tpu.pipeline_mode<synchronous>, transform_indices = @transform_1, window_bounds = array<i64: 8, 1>}, {pipeline_mode = #tpu.pipeline_mode<synchronous>, transform_indices = @transform_2, window_bounds = array<i64: 8, 1>}, {pipeline_mode = #tpu.pipeline_mode<synchronous>, transform_indices = @transform_3, window_bounds = array<i64: 4, 9>}, {pipeline_mode = #tpu.pipeline_mode<synchronous>, transform_indices = @transform_4, window_bounds = array<i64: 9, 256>}, {pipeline_mode = #tpu.pipeline_mode<synchronous>, transform_indices = @transform_5, window_bounds = array<i64: 256, 256>}, {pipeline_mode = #tpu.pipeline_mode<synchronous>, transform_indices = @transform_6, window_bounds = array<i64: 256, 256>}, {pipeline_mode = #tpu.pipeline_mode<synchronous>, transform_indices = @transform_7, window_bounds = array<i64: 256, 256>}, {pipeline_mode = #tpu.pipeline_mode<synchronous>, transform_indices = @transform_8, window_bounds = array<i64: 256, 256>}, {pipeline_mode = #tpu.pipeline_mode<synchronous>, transform_indices = @transform_9, window_bounds = array<i64: 4, 256>}, {pipeline_mode = #tpu.pipeline_mode<synchronous>, transform_indices = @transform_10, window_bounds = array<i64: 4, 256>}, {pipeline_mode = #tpu.pipeline_mode<synchronous>, transform_indices = @transform_11, window_bounds = array<i64: 4, 1>}, {pipeline_mode = #tpu.pipeline_mode<synchronous>, transform_indices = @transform_12, window_bounds = array<i64: 4, 1>}, {pipeline_mode = #tpu.pipeline_mode<synchronous>, transform_indices = @transform_13, window_bounds = array<i64: 4, 1>}, {pipeline_mode = #tpu.pipeline_mode<synchronous>, transform_indices = @transform_14, window_bounds = array<i64: 4, 1>}, {transform_indices = @transform_15, window_bounds = array<i64: 1, 4, 512>}]} {
    %c0 = arith.constant 0 : index
    %c0_0 = arith.constant 0 : index
    %c0_1 = arith.constant 0 : index
    %0 = vector.load %arg1[%c0, %c0_0, %c0_1] : memref<1x8x256xf32, #tpu.memory_space<vmem>>, vector<1x8x256xf32>
    %1 = vector.shape_cast %0 : vector<1x8x256xf32> to vector<8x256xf32>
    %cst = arith.constant dense<0.000000e+00> : vector<256xf32>
    %2 = vector.multi_reduction <add>, %1, %cst [0] : vector<8x256xf32> to vector<256xf32>
    %3 = vector.shape_cast %2 : vector<256xf32> to vector<1x256xf32>
    %cst_2 = arith.constant 8.000000e+00 : f32
    %4 = vector.broadcast %cst_2 : f32 to vector<1x256xf32>
    %5 = arith.divf %3, %4 : vector<1x256xf32>
    %6 = vector.broadcast %5 : vector<1x256xf32> to vector<8x256xf32>
    %7 = arith.subf %1, %6 : vector<8x256xf32>
    %8 = arith.mulf %7, %7 : vector<8x256xf32>
    %cst_3 = arith.constant dense<0.000000e+00> : vector<256xf32>
    %9 = vector.multi_reduction <add>, %8, %cst_3 [0] : vector<8x256xf32> to vector<256xf32>
    %10 = vector.shape_cast %9 : vector<256xf32> to vector<1x256xf32>
    %cst_4 = arith.constant 8.000000e+00 : f32
    %11 = vector.broadcast %cst_4 : f32 to vector<1x256xf32>
    %12 = arith.divf %10, %11 : vector<1x256xf32>
    %13 = vector.broadcast %5 : vector<1x256xf32> to vector<8x256xf32>
    %14 = arith.subf %1, %13 : vector<8x256xf32>
    %cst_5 = arith.constant 9.99999997E-7 : f32
    %15 = vector.broadcast %cst_5 : f32 to vector<1x256xf32>
    %16 = arith.addf %12, %15 : vector<1x256xf32>
    %17 = math.rsqrt %16 : vector<1x256xf32>
    %18 = vector.broadcast %17 : vector<1x256xf32> to vector<8x256xf32>
    %19 = arith.mulf %14, %18 : vector<8x256xf32>
    %c0_6 = arith.constant 0 : index
    %c0_7 = arith.constant 0 : index
    %20 = vector.load %arg2[%c0_6, %c0_7] : memref<8x1xf32, #tpu.memory_space<vmem>>, vector<8x1xf32>
    %21 = vector.broadcast %20 : vector<8x1xf32> to vector<8x256xf32>
    %22 = arith.mulf %21, %19 : vector<8x256xf32>
    %c0_8 = arith.constant 0 : index
    %c0_9 = arith.constant 0 : index
    %23 = vector.load %arg3[%c0_8, %c0_9] : memref<8x1xf32, #tpu.memory_space<vmem>>, vector<8x1xf32>
    %24 = vector.broadcast %23 : vector<8x1xf32> to vector<8x256xf32>
    %25 = arith.addf %22, %24 : vector<8x256xf32>
    %26 = vector.extract_strided_slice %25 {offsets = [0, 0], sizes = [4, 256], strides = [1, 1]} : vector<8x256xf32> to vector<4x256xf32>
    %27 = vector.extract_strided_slice %25 {offsets = [4, 0], sizes = [4, 256], strides = [1, 1]} : vector<8x256xf32> to vector<4x256xf32>
    %c0_10 = arith.constant 0 : index
    %c0_11 = arith.constant 0 : index
    %28 = vector.load %arg4[%c0_10, %c0_11] : memref<4x9xf32, #tpu.memory_space<vmem>>, vector<4x9xf32>
    %c0_12 = arith.constant 0 : index
    %c0_13 = arith.constant 0 : index
    %29 = vector.load %arg5[%c0_12, %c0_13] : memref<9x256xf32, #tpu.memory_space<vmem>>, vector<9x256xf32>
    %cst_14 = arith.constant 0.000000e+00 : f32
    %30 = vector.broadcast %cst_14 : f32 to vector<4x256xf32>
    %31 = vector.extract_strided_slice %26 {offsets = [0, 239], sizes = [4, 17], strides = [1, 1]} : vector<4x256xf32> to vector<4x17xf32>
    %32 = vector.extract_strided_slice %26 {offsets = [0, 0], sizes = [4, 239], strides = [1, 1]} : vector<4x256xf32> to vector<4x239xf32>
    %33 = tpu.concatenate %31, %32 in 1 : vector<4x17xf32>, vector<4x239xf32> -> vector<4x256xf32>
    %34 = vector.extract_strided_slice %28 {offsets = [0, 0], sizes = [4, 1], strides = [1, 1]} : vector<4x9xf32> to vector<4x1xf32>
    %35 = vector.shape_cast %34 : vector<4x1xf32> to vector<4xf32>
    %36 = vector.shape_cast %35 : vector<4xf32> to vector<4x1xf32>
    %37 = vector.extract_strided_slice %29 {offsets = [0, 0], sizes = [1, 256], strides = [1, 1]} : vector<9x256xf32> to vector<1x256xf32>
    %38 = vector.shape_cast %37 : vector<1x256xf32> to vector<256xf32>
    %39 = vector.shape_cast %38 : vector<256xf32> to vector<1x256xf32>
    %40 = vector.broadcast %39 : vector<1x256xf32> to vector<4x256xf32>
    %41 = arith.mulf %33, %40 : vector<4x256xf32>
    %42 = vector.broadcast %36 : vector<4x1xf32> to vector<4x256xf32>
    %43 = arith.mulf %42, %41 : vector<4x256xf32>
    %44 = arith.addf %30, %43 : vector<4x256xf32>
    %45 = vector.extract_strided_slice %26 {offsets = [0, 240], sizes = [4, 16], strides = [1, 1]} : vector<4x256xf32> to vector<4x16xf32>
    %46 = vector.extract_strided_slice %26 {offsets = [0, 0], sizes = [4, 240], strides = [1, 1]} : vector<4x256xf32> to vector<4x240xf32>
    %47 = tpu.concatenate %45, %46 in 1 : vector<4x16xf32>, vector<4x240xf32> -> vector<4x256xf32>
    %48 = vector.extract_strided_slice %28 {offsets = [0, 1], sizes = [4, 1], strides = [1, 1]} : vector<4x9xf32> to vector<4x1xf32>
    %49 = vector.shape_cast %48 : vector<4x1xf32> to vector<4xf32>
    %50 = vector.shape_cast %49 : vector<4xf32> to vector<4x1xf32>
    %51 = vector.extract_strided_slice %29 {offsets = [1, 0], sizes = [1, 256], strides = [1, 1]} : vector<9x256xf32> to vector<1x256xf32>
    %52 = vector.shape_cast %51 : vector<1x256xf32> to vector<256xf32>
    %53 = vector.shape_cast %52 : vector<256xf32> to vector<1x256xf32>
    %54 = vector.broadcast %53 : vector<1x256xf32> to vector<4x256xf32>
    %55 = arith.mulf %47, %54 : vector<4x256xf32>
    %56 = vector.broadcast %50 : vector<4x1xf32> to vector<4x256xf32>
    %57 = arith.mulf %56, %55 : vector<4x256xf32>
    %58 = arith.addf %44, %57 : vector<4x256xf32>
    %59 = vector.extract_strided_slice %26 {offsets = [0, 241], sizes = [4, 15], strides = [1, 1]} : vector<4x256xf32> to vector<4x15xf32>
    %60 = vector.extract_strided_slice %26 {offsets = [0, 0], sizes = [4, 241], strides = [1, 1]} : vector<4x256xf32> to vector<4x241xf32>
    %61 = tpu.concatenate %59, %60 in 1 : vector<4x15xf32>, vector<4x241xf32> -> vector<4x256xf32>
    %62 = vector.extract_strided_slice %28 {offsets = [0, 2], sizes = [4, 1], strides = [1, 1]} : vector<4x9xf32> to vector<4x1xf32>
    %63 = vector.shape_cast %62 : vector<4x1xf32> to vector<4xf32>
    %64 = vector.shape_cast %63 : vector<4xf32> to vector<4x1xf32>
    %65 = vector.extract_strided_slice %29 {offsets = [2, 0], sizes = [1, 256], strides = [1, 1]} : vector<9x256xf32> to vector<1x256xf32>
    %66 = vector.shape_cast %65 : vector<1x256xf32> to vector<256xf32>
    %67 = vector.shape_cast %66 : vector<256xf32> to vector<1x256xf32>
    %68 = vector.broadcast %67 : vector<1x256xf32> to vector<4x256xf32>
    %69 = arith.mulf %61, %68 : vector<4x256xf32>
    %70 = vector.broadcast %64 : vector<4x1xf32> to vector<4x256xf32>
    %71 = arith.mulf %70, %69 : vector<4x256xf32>
    %72 = arith.addf %58, %71 : vector<4x256xf32>
    %73 = vector.extract_strided_slice %26 {offsets = [0, 255], sizes = [4, 1], strides = [1, 1]} : vector<4x256xf32> to vector<4x1xf32>
    %74 = vector.extract_strided_slice %26 {offsets = [0, 0], sizes = [4, 255], strides = [1, 1]} : vector<4x256xf32> to vector<4x255xf32>
    %75 = tpu.concatenate %73, %74 in 1 : vector<4x1xf32>, vector<4x255xf32> -> vector<4x256xf32>
    %76 = vector.extract_strided_slice %28 {offsets = [0, 3], sizes = [4, 1], strides = [1, 1]} : vector<4x9xf32> to vector<4x1xf32>
    %77 = vector.shape_cast %76 : vector<4x1xf32> to vector<4xf32>
    %78 = vector.shape_cast %77 : vector<4xf32> to vector<4x1xf32>
    %79 = vector.extract_strided_slice %29 {offsets = [3, 0], sizes = [1, 256], strides = [1, 1]} : vector<9x256xf32> to vector<1x256xf32>
    %80 = vector.shape_cast %79 : vector<1x256xf32> to vector<256xf32>
    %81 = vector.shape_cast %80 : vector<256xf32> to vector<1x256xf32>
    %82 = vector.broadcast %81 : vector<1x256xf32> to vector<4x256xf32>
    %83 = arith.mulf %75, %82 : vector<4x256xf32>
    %84 = vector.broadcast %78 : vector<4x1xf32> to vector<4x256xf32>
    %85 = arith.mulf %84, %83 : vector<4x256xf32>
    %86 = arith.addf %72, %85 : vector<4x256xf32>
    %87 = vector.extract_strided_slice %28 {offsets = [0, 4], sizes = [4, 1], strides = [1, 1]} : vector<4x9xf32> to vector<4x1xf32>
    %88 = vector.shape_cast %87 : vector<4x1xf32> to vector<4xf32>
    %89 = vector.shape_cast %88 : vector<4xf32> to vector<4x1xf32>
    %90 = vector.extract_strided_slice %29 {offsets = [4, 0], sizes = [1, 256], strides = [1, 1]} : vector<9x256xf32> to vector<1x256xf32>
    %91 = vector.shape_cast %90 : vector<1x256xf32> to vector<256xf32>
    %92 = vector.shape_cast %91 : vector<256xf32> to vector<1x256xf32>
    %93 = vector.broadcast %92 : vector<1x256xf32> to vector<4x256xf32>
    %94 = arith.mulf %26, %93 : vector<4x256xf32>
    %95 = vector.broadcast %89 : vector<4x1xf32> to vector<4x256xf32>
    %96 = arith.mulf %95, %94 : vector<4x256xf32>
    %97 = arith.addf %86, %96 : vector<4x256xf32>
    %98 = vector.extract_strided_slice %26 {offsets = [0, 1], sizes = [4, 255], strides = [1, 1]} : vector<4x256xf32> to vector<4x255xf32>
    %99 = vector.extract_strided_slice %26 {offsets = [0, 0], sizes = [4, 1], strides = [1, 1]} : vector<4x256xf32> to vector<4x1xf32>
    %100 = tpu.concatenate %98, %99 in 1 : vector<4x255xf32>, vector<4x1xf32> -> vector<4x256xf32>
    %101 = vector.extract_strided_slice %28 {offsets = [0, 5], sizes = [4, 1], strides = [1, 1]} : vector<4x9xf32> to vector<4x1xf32>
    %102 = vector.shape_cast %101 : vector<4x1xf32> to vector<4xf32>
    %103 = vector.shape_cast %102 : vector<4xf32> to vector<4x1xf32>
    %104 = vector.extract_strided_slice %29 {offsets = [5, 0], sizes = [1, 256], strides = [1, 1]} : vector<9x256xf32> to vector<1x256xf32>
    %105 = vector.shape_cast %104 : vector<1x256xf32> to vector<256xf32>
    %106 = vector.shape_cast %105 : vector<256xf32> to vector<1x256xf32>
    %107 = vector.broadcast %106 : vector<1x256xf32> to vector<4x256xf32>
    %108 = arith.mulf %100, %107 : vector<4x256xf32>
    %109 = vector.broadcast %103 : vector<4x1xf32> to vector<4x256xf32>
    %110 = arith.mulf %109, %108 : vector<4x256xf32>
    %111 = arith.addf %97, %110 : vector<4x256xf32>
    %112 = vector.extract_strided_slice %26 {offsets = [0, 15], sizes = [4, 241], strides = [1, 1]} : vector<4x256xf32> to vector<4x241xf32>
    %113 = vector.extract_strided_slice %26 {offsets = [0, 0], sizes = [4, 15], strides = [1, 1]} : vector<4x256xf32> to vector<4x15xf32>
    %114 = tpu.concatenate %112, %113 in 1 : vector<4x241xf32>, vector<4x15xf32> -> vector<4x256xf32>
    %115 = vector.extract_strided_slice %28 {offsets = [0, 6], sizes = [4, 1], strides = [1, 1]} : vector<4x9xf32> to vector<4x1xf32>
    %116 = vector.shape_cast %115 : vector<4x1xf32> to vector<4xf32>
    %117 = vector.shape_cast %116 : vector<4xf32> to vector<4x1xf32>
    %118 = vector.extract_strided_slice %29 {offsets = [6, 0], sizes = [1, 256], strides = [1, 1]} : vector<9x256xf32> to vector<1x256xf32>
    %119 = vector.shape_cast %118 : vector<1x256xf32> to vector<256xf32>
    %120 = vector.shape_cast %119 : vector<256xf32> to vector<1x256xf32>
    %121 = vector.broadcast %120 : vector<1x256xf32> to vector<4x256xf32>
    %122 = arith.mulf %114, %121 : vector<4x256xf32>
    %123 = vector.broadcast %117 : vector<4x1xf32> to vector<4x256xf32>
    %124 = arith.mulf %123, %122 : vector<4x256xf32>
    %125 = arith.addf %111, %124 : vector<4x256xf32>
    %126 = vector.extract_strided_slice %26 {offsets = [0, 16], sizes = [4, 240], strides = [1, 1]} : vector<4x256xf32> to vector<4x240xf32>
    %127 = vector.extract_strided_slice %26 {offsets = [0, 0], sizes = [4, 16], strides = [1, 1]} : vector<4x256xf32> to vector<4x16xf32>
    %128 = tpu.concatenate %126, %127 in 1 : vector<4x240xf32>, vector<4x16xf32> -> vector<4x256xf32>
    %129 = vector.extract_strided_slice %28 {offsets = [0, 7], sizes = [4, 1], strides = [1, 1]} : vector<4x9xf32> to vector<4x1xf32>
    %130 = vector.shape_cast %129 : vector<4x1xf32> to vector<4xf32>
    %131 = vector.shape_cast %130 : vector<4xf32> to vector<4x1xf32>
    %132 = vector.extract_strided_slice %29 {offsets = [7, 0], sizes = [1, 256], strides = [1, 1]} : vector<9x256xf32> to vector<1x256xf32>
    %133 = vector.shape_cast %132 : vector<1x256xf32> to vector<256xf32>
    %134 = vector.shape_cast %133 : vector<256xf32> to vector<1x256xf32>
    %135 = vector.broadcast %134 : vector<1x256xf32> to vector<4x256xf32>
    %136 = arith.mulf %128, %135 : vector<4x256xf32>
    %137 = vector.broadcast %131 : vector<4x1xf32> to vector<4x256xf32>
    %138 = arith.mulf %137, %136 : vector<4x256xf32>
    %139 = arith.addf %125, %138 : vector<4x256xf32>
    %140 = vector.extract_strided_slice %26 {offsets = [0, 17], sizes = [4, 239], strides = [1, 1]} : vector<4x256xf32> to vector<4x239xf32>
    %141 = vector.extract_strided_slice %26 {offsets = [0, 0], sizes = [4, 17], strides = [1, 1]} : vector<4x256xf32> to vector<4x17xf32>
    %142 = tpu.concatenate %140, %141 in 1 : vector<4x239xf32>, vector<4x17xf32> -> vector<4x256xf32>
    %143 = vector.extract_strided_slice %28 {offsets = [0, 8], sizes = [4, 1], strides = [1, 1]} : vector<4x9xf32> to vector<4x1xf32>
    %144 = vector.shape_cast %143 : vector<4x1xf32> to vector<4xf32>
    %145 = vector.shape_cast %144 : vector<4xf32> to vector<4x1xf32>
    %146 = vector.extract_strided_slice %29 {offsets = [8, 0], sizes = [1, 256], strides = [1, 1]} : vector<9x256xf32> to vector<1x256xf32>
    %147 = vector.shape_cast %146 : vector<1x256xf32> to vector<256xf32>
    %148 = vector.shape_cast %147 : vector<256xf32> to vector<1x256xf32>
    %149 = vector.broadcast %148 : vector<1x256xf32> to vector<4x256xf32>
    %150 = arith.mulf %142, %149 : vector<4x256xf32>
    %151 = vector.broadcast %145 : vector<4x1xf32> to vector<4x256xf32>
    %152 = arith.mulf %151, %150 : vector<4x256xf32>
    %153 = arith.addf %139, %152 : vector<4x256xf32>
    %154 = arith.truncf %27 : vector<4x256xf32> to vector<4x256xbf16>
    %c0_15 = arith.constant 0 : index
    %c0_16 = arith.constant 0 : index
    %155 = vector.load %arg6[%c0_15, %c0_16] : memref<256x256xbf16, #tpu.memory_space<vmem>>, vector<256x256xbf16>
    %cst_17 = arith.constant dense<0.000000e+00> : vector<4x256xf32>
    %156 = tpu.matmul %154, %155, %cst_17 {dimension_numbers = #tpu.dot_dimension_numbers<[1], [0], [0], [1], [0, 0, 1, 1], [], []>} : vector<4x256xbf16>, vector<256x256xbf16>, vector<4x256xf32> -> vector<4x256xf32>
    %c0_18 = arith.constant 0 : index
    %c0_19 = arith.constant 0 : index
    %157 = vector.load %arg7[%c0_18, %c0_19] : memref<256x256xbf16, #tpu.memory_space<vmem>>, vector<256x256xbf16>
    %cst_20 = arith.constant dense<0.000000e+00> : vector<4x256xf32>
    %158 = tpu.matmul %154, %157, %cst_20 {dimension_numbers = #tpu.dot_dimension_numbers<[1], [0], [0], [1], [0, 0, 1, 1], [], []>} : vector<4x256xbf16>, vector<256x256xbf16>, vector<4x256xf32> -> vector<4x256xf32>
    %c0_21 = arith.constant 0 : index
    %c0_22 = arith.constant 0 : index
    %159 = vector.load %arg10[%c0_21, %c0_22] : memref<4x256xf32, #tpu.memory_space<vmem>>, vector<4x256xf32>
    %c0_23 = arith.constant 0 : index
    %c0_24 = arith.constant 0 : index
    %160 = vector.load %arg11[%c0_23, %c0_24] : memref<4x256xf32, #tpu.memory_space<vmem>>, vector<4x256xf32>
    %161 = arith.mulf %156, %159 : vector<4x256xf32>
    %162 = arith.mulf %158, %160 : vector<4x256xf32>
    %163 = arith.subf %161, %162 : vector<4x256xf32>
    %164 = arith.mulf %156, %160 : vector<4x256xf32>
    %165 = arith.mulf %158, %159 : vector<4x256xf32>
    %166 = arith.addf %164, %165 : vector<4x256xf32>
    %167 = arith.truncf %163 : vector<4x256xf32> to vector<4x256xbf16>
    %c0_25 = arith.constant 0 : index
    %c0_26 = arith.constant 0 : index
    %168 = vector.load %arg8[%c0_25, %c0_26] : memref<256x256xbf16, #tpu.memory_space<vmem>>, vector<256x256xbf16>
    %cst_27 = arith.constant dense<0.000000e+00> : vector<4x256xf32>
    %169 = tpu.matmul %167, %168, %cst_27 {dimension_numbers = #tpu.dot_dimension_numbers<[1], [0], [0], [1], [0, 0, 1, 1], [], []>} : vector<4x256xbf16>, vector<256x256xbf16>, vector<4x256xf32> -> vector<4x256xf32>
    %170 = arith.truncf %166 : vector<4x256xf32> to vector<4x256xbf16>
    %c0_28 = arith.constant 0 : index
    %c0_29 = arith.constant 0 : index
    %171 = vector.load %arg9[%c0_28, %c0_29] : memref<256x256xbf16, #tpu.memory_space<vmem>>, vector<256x256xbf16>
    %cst_30 = arith.constant dense<0.000000e+00> : vector<4x256xf32>
    %172 = tpu.matmul %170, %171, %cst_30 {dimension_numbers = #tpu.dot_dimension_numbers<[1], [0], [0], [1], [0, 0, 1, 1], [], []>} : vector<4x256xbf16>, vector<256x256xbf16>, vector<4x256xf32> -> vector<4x256xf32>
    %173 = arith.addf %169, %172 : vector<4x256xf32>
    %cst_31 = arith.constant dense<0.000000e+00> : vector<256xf32>
    %174 = vector.multi_reduction <add>, %153, %cst_31 [0] : vector<4x256xf32> to vector<256xf32>
    %175 = vector.shape_cast %174 : vector<256xf32> to vector<1x256xf32>
    %cst_32 = arith.constant dense<0.000000e+00> : vector<256xf32>
    %176 = vector.multi_reduction <add>, %173, %cst_32 [0] : vector<4x256xf32> to vector<256xf32>
    %177 = vector.shape_cast %176 : vector<256xf32> to vector<1x256xf32>
    %178 = arith.addf %175, %177 : vector<1x256xf32>
    %cst_33 = arith.constant 8.000000e+00 : f32
    %179 = vector.broadcast %cst_33 : f32 to vector<1x256xf32>
    %180 = arith.divf %178, %179 : vector<1x256xf32>
    %181 = vector.broadcast %180 : vector<1x256xf32> to vector<4x256xf32>
    %182 = arith.subf %153, %181 : vector<4x256xf32>
    %183 = arith.mulf %182, %182 : vector<4x256xf32>
    %cst_34 = arith.constant dense<0.000000e+00> : vector<256xf32>
    %184 = vector.multi_reduction <add>, %183, %cst_34 [0] : vector<4x256xf32> to vector<256xf32>
    %185 = vector.shape_cast %184 : vector<256xf32> to vector<1x256xf32>
    %186 = vector.broadcast %180 : vector<1x256xf32> to vector<4x256xf32>
    %187 = arith.subf %173, %186 : vector<4x256xf32>
    %188 = arith.mulf %187, %187 : vector<4x256xf32>
    %cst_35 = arith.constant dense<0.000000e+00> : vector<256xf32>
    %189 = vector.multi_reduction <add>, %188, %cst_35 [0] : vector<4x256xf32> to vector<256xf32>
    %190 = vector.shape_cast %189 : vector<256xf32> to vector<1x256xf32>
    %191 = arith.addf %185, %190 : vector<1x256xf32>
    %cst_36 = arith.constant 8.000000e+00 : f32
    %192 = vector.broadcast %cst_36 : f32 to vector<1x256xf32>
    %193 = arith.divf %191, %192 : vector<1x256xf32>
    %cst_37 = arith.constant 9.99999997E-7 : f32
    %194 = vector.broadcast %cst_37 : f32 to vector<1x256xf32>
    %195 = arith.addf %193, %194 : vector<1x256xf32>
    %196 = math.rsqrt %195 : vector<1x256xf32>
    %c0_38 = arith.constant 0 : index
    %c0_39 = arith.constant 0 : index
    %197 = vector.load %arg12[%c0_38, %c0_39] : memref<4x1xf32, #tpu.memory_space<vmem>>, vector<4x1xf32>
    %198 = vector.broadcast %180 : vector<1x256xf32> to vector<4x256xf32>
    %199 = arith.subf %153, %198 : vector<4x256xf32>
    %200 = vector.broadcast %196 : vector<1x256xf32> to vector<4x256xf32>
    %201 = arith.mulf %199, %200 : vector<4x256xf32>
    %202 = vector.broadcast %197 : vector<4x1xf32> to vector<4x256xf32>
    %203 = arith.mulf %202, %201 : vector<4x256xf32>
    %c0_40 = arith.constant 0 : index
    %c0_41 = arith.constant 0 : index
    %204 = vector.load %arg13[%c0_40, %c0_41] : memref<4x1xf32, #tpu.memory_space<vmem>>, vector<4x1xf32>
    %205 = vector.broadcast %204 : vector<4x1xf32> to vector<4x256xf32>
    %206 = arith.addf %203, %205 : vector<4x256xf32>
    %c0_42 = arith.constant 0 : index
    %c0_43 = arith.constant 0 : index
    %207 = vector.load %arg14[%c0_42, %c0_43] : memref<4x1xf32, #tpu.memory_space<vmem>>, vector<4x1xf32>
    %208 = vector.broadcast %180 : vector<1x256xf32> to vector<4x256xf32>
    %209 = arith.subf %173, %208 : vector<4x256xf32>
    %210 = vector.broadcast %196 : vector<1x256xf32> to vector<4x256xf32>
    %211 = arith.mulf %209, %210 : vector<4x256xf32>
    %212 = vector.broadcast %207 : vector<4x1xf32> to vector<4x256xf32>
    %213 = arith.mulf %212, %211 : vector<4x256xf32>
    %c0_44 = arith.constant 0 : index
    %c0_45 = arith.constant 0 : index
    %214 = vector.load %arg15[%c0_44, %c0_45] : memref<4x1xf32, #tpu.memory_space<vmem>>, vector<4x1xf32>
    %215 = vector.broadcast %214 : vector<4x1xf32> to vector<4x256xf32>
    %216 = arith.addf %213, %215 : vector<4x256xf32>
    %c0_46 = arith.constant 0 : index
    %c0_47 = arith.constant 0 : index
    %c0_48 = arith.constant 0 : index
    %217 = vector.load %arg16[%c0_46, %c0_47, %c0_48] : memref<1x4x512xf32, #tpu.memory_space<vmem>>, vector<1x4x256xf32>
    %218 = vector.shape_cast %217 : vector<1x4x256xf32> to vector<4x256xf32>
    %219 = vector.shape_cast %206 : vector<4x256xf32> to vector<1x4x256xf32>
    tpu.vector_store %arg16[%c0_46, %c0_47, %c0_48], %219 {strides = array<i32>} : memref<1x4x512xf32, #tpu.memory_space<vmem>>, vector<1x4x256xf32>,
    %c0_49 = arith.constant 0 : index
    %c0_50 = arith.constant 0 : index
    %c256 = arith.constant 256 : index
    %220 = vector.load %arg16[%c0_49, %c0_50, %c256] : memref<1x4x512xf32, #tpu.memory_space<vmem>>, vector<1x4x256xf32>
    %221 = vector.shape_cast %220 : vector<1x4x256xf32> to vector<4x256xf32>
    %222 = vector.shape_cast %216 : vector<4x256xf32> to vector<1x4x256xf32>
    tpu.vector_store %arg16[%c0_49, %c0_50, %c256], %222 {strides = array<i32>} : memref<1x4x512xf32, #tpu.memory_space<vmem>>, vector<1x4x256xf32>,
    return
  }
  func.func @transform_0(%arg0: i32) -> (i32, i32, i32) {
    %c0_i32 = arith.constant 0 : i32
    %c0_i32_0 = arith.constant 0 : i32
    %c0_i32_1 = arith.constant 0 : i32
    return %arg0, %c0_i32, %c0_i32_0 : i32, i32, i32
  }
  func.func @transform_1(%arg0: i32) -> (i32, i32) {
    %c0_i32 = arith.constant 0 : i32
    %c0_i32_0 = arith.constant 0 : i32
    %c0_i32_1 = arith.constant 0 : i32
    return %c0_i32, %c0_i32_0 : i32, i32
  }
  func.func @transform_2(%arg0: i32) -> (i32, i32) {
    %c0_i32 = arith.constant 0 : i32
    %c0_i32_0 = arith.constant 0 : i32
    %c0_i32_1 = arith.constant 0 : i32
    return %c0_i32, %c0_i32_0 : i32, i32
  }
  func.func @transform_3(%arg0: i32) -> (i32, i32) {
    %c0_i32 = arith.constant 0 : i32
    %c0_i32_0 = arith.constant 0 : i32
    %c0_i32_1 = arith.constant 0 : i32
    return %c0_i32, %c0_i32_0 : i32, i32
  }
  func.func @transform_4(%arg0: i32) -> (i32, i32) {
    %c0_i32 = arith.constant 0 : i32
    %c0_i32_0 = arith.constant 0 : i32
    %c0_i32_1 = arith.constant 0 : i32
    return %c0_i32, %c0_i32_0 : i32, i32
  }
  func.func @transform_5(%arg0: i32) -> (i32, i32) {
    %c0_i32 = arith.constant 0 : i32
    %c0_i32_0 = arith.constant 0 : i32
    %c0_i32_1 = arith.constant 0 : i32
    return %c0_i32, %c0_i32_0 : i32, i32
  }
  func.func @transform_6(%arg0: i32) -> (i32, i32) {
    %c0_i32 = arith.constant 0 : i32
    %c0_i32_0 = arith.constant 0 : i32
    %c0_i32_1 = arith.constant 0 : i32
    return %c0_i32, %c0_i32_0 : i32, i32
  }
  func.func @transform_7(%arg0: i32) -> (i32, i32) {
    %c0_i32 = arith.constant 0 : i32
    %c0_i32_0 = arith.constant 0 : i32
    %c0_i32_1 = arith.constant 0 : i32
    return %c0_i32, %c0_i32_0 : i32, i32
  }
  func.func @transform_8(%arg0: i32) -> (i32, i32) {
    %c0_i32 = arith.constant 0 : i32
    %c0_i32_0 = arith.constant 0 : i32
    %c0_i32_1 = arith.constant 0 : i32
    return %c0_i32, %c0_i32_0 : i32, i32
  }
  func.func @transform_9(%arg0: i32) -> (i32, i32) {
    %c0_i32 = arith.constant 0 : i32
    %c0_i32_0 = arith.constant 0 : i32
    %c0_i32_1 = arith.constant 0 : i32
    return %c0_i32, %c0_i32_0 : i32, i32
  }
  func.func @transform_10(%arg0: i32) -> (i32, i32) {
    %c0_i32 = arith.constant 0 : i32
    %c0_i32_0 = arith.constant 0 : i32
    %c0_i32_1 = arith.constant 0 : i32
    return %c0_i32, %c0_i32_0 : i32, i32
  }
  func.func @transform_11(%arg0: i32) -> (i32, i32) {
    %c0_i32 = arith.constant 0 : i32
    %c0_i32_0 = arith.constant 0 : i32
    %c0_i32_1 = arith.constant 0 : i32
    return %c0_i32, %c0_i32_0 : i32, i32
  }
  func.func @transform_12(%arg0: i32) -> (i32, i32) {
    %c0_i32 = arith.constant 0 : i32
    %c0_i32_0 = arith.constant 0 : i32
    %c0_i32_1 = arith.constant 0 : i32
    return %c0_i32, %c0_i32_0 : i32, i32
  }
  func.func @transform_13(%arg0: i32) -> (i32, i32) {
    %c0_i32 = arith.constant 0 : i32
    %c0_i32_0 = arith.constant 0 : i32
    %c0_i32_1 = arith.constant 0 : i32
    return %c0_i32, %c0_i32_0 : i32, i32
  }
  func.func @transform_14(%arg0: i32) -> (i32, i32) {
    %c0_i32 = arith.constant 0 : i32
    %c0_i32_0 = arith.constant 0 : i32
    %c0_i32_1 = arith.constant 0 : i32
    return %c0_i32, %c0_i32_0 : i32, i32
  }
  func.func @transform_15(%arg0: i32) -> (i32, i32, i32) {
    %c0_i32 = arith.constant 0 : i32
    %c0_i32_0 = arith.constant 0 : i32
    %c0_i32_1 = arith.constant 0 : i32
    return %arg0, %c0_i32, %c0_i32_0 : i32, i32, i32
  }
}

</mosaic_0001>

<bundles_post_ra>
// kernel: tpu_custom_call.1
= control target key start
LH: loop header
LB: loop body
LE: loop exit
PB: predicated region body
PF: predicated region fallthrough
CT: control target
= control target key end

     0   :  { %s3384_s0 = inlined_call_operand.vmem [shape: f32[2,8,256], index: 0, kind: input, shape index: {}]   ;;  %s3385_s1 = inlined_call_operand.vmem [shape: f32[8,1], index: 1, kind: input, shape index: {}]   ;;  %s3386_s2 = inlined_call_operand.vmem [shape: f32[8,1], index: 2, kind: input, shape index: {}]   ;;  %s3387_s3 = inlined_call_operand.hbm [shape: f32[4,9], index: 3, kind: input, shape index: {}]   ;;  %s3388_s4 = inlined_call_operand.hbm [shape: f32[9,256], index: 4, kind: input, shape index: {}]   ;;  %s3389_s5 = inlined_call_operand.hbm [shape: bf16[256,256], index: 5, kind: input, shape index: {}]   ;;  %s3390_s6 = inlined_call_operand.hbm [shape: bf16[256,256], index: 6, kind: input, shape index: {}]   ;;  %s3391_s7 = inlined_call_operand.hbm [shape: bf16[256,256], index: 7, kind: input, shape index: {}]   ;;  %s3392_s8 = inlined_call_operand.hbm [shape: bf16[256,256], index: 8, kind: input, shape index: {}]   ;;  %s3393_s9 = inlined_call_operand.vmem [shape: f32[4,256], index: 9, kind: input, shape index: {}]   ;;  %s3394_s10 = inlined_call_operand.vmem [shape: f32[4,256], index: 10, kind: input, shape index: {}]   ;;  %s3395_s11 = inlined_call_operand.vmem [shape: f32[4,1], index: 11, kind: input, shape index: {}]   ;;  %s3396_s12 = inlined_call_operand.vmem [shape: f32[4,1], index: 12, kind: input, shape index: {}]   ;;  %s3397_s13 = inlined_call_operand.vmem [shape: f32[4,1], index: 13, kind: input, shape index: {}]   ;;  %s3398_s14 = inlined_call_operand.vmem [shape: f32[4,1], index: 14, kind: input, shape index: {}]   ;;  %s3399_s15 = inlined_call_operand.hbm [shape: f32[2,4,512], index: 15, kind: output, shape index: {}]  }
   0x1   :  { %3413 = sst [smem:[#allocation27_spill]] %s3393_s9 }
   0x2   :  { %3414 = sst [smem:[#allocation28_spill]] %s3394_s10 }
   0x3   :  { %3415 = sst [smem:[#allocation29_spill]] %s3396_s12 }
   0x4   :  { %3416 = sst [smem:[#allocation30_spill]] %s3399_s15 }
   0x5   :  { %20 = vsyncpa [#allocation3], 0 }
   0x6   :  { %21 = vsyncpa [#allocation6], 0 }
   0x7   :  { %22 = vsyncpa [#allocation9], 0 }
   0x8   :  { %23 = vsyncpa [#allocation12], 0 }
   0x9   :  { %24 = vsyncpa [#allocation4], 0 }
   0xa   :  { %26 = vsyncpa [#allocation4 + $0x1], 0  ;;  %s2958_s18 = smov 0   ;;  %s2960_s19 = smov 0  }
   0xb   :  { %s2962_s20 = smov 0   ;;  %s2964_s21 = smov 0  }
   0xc LB: > { %3417 = sst [smem:[#allocation19_spill]] %s2836_s18  ;;  %s2979_s22 = sadd.s32 4294967295, %s2848_s21   ;;  %s2848_s21 = sphi %s2964_s21, %s3450_s21   ;;  %s2844_s20 = sphi %s2962_s20, %s3453_s20   ;;  %s2840_s19 = sphi %s2960_s19, %s3452_s19   ;;  %s2836_s18 = sphi %s2958_s18, %s3451_s18  }
   0xd   : > { %3418 = sst [smem:[#allocation20_spill]] %s2840_s19  ;;  %s2107_s23 = sadd.s32 4294967294, %s2848_s21  }
   0xe   : > { %3419 = sst [smem:[#allocation21_spill]] %s2844_s20  ;;  %s2983_s24 = sadd.s32 1, %s2848_s21  }
   0xf   : > { %3420 = sst [smem:[#allocation22_spill]] %s2848_s21  ;;  %s359_s25 = sadd.s32 1, %s2844_s20 }
  0x10   : > { %3421 = sst [smem:[#allocation23_spill]] %s2983_s24  ;;  %s356_s26 = ssub.s32 %s2848_s21, %s2983_s24 }
  0x11   : > { %p369_p0 = scmp.ne.s32.totalorder %s2844_s20, %s2840_s19  ;;  %p357_p1 = scmp.eq.s32.totalorder %s356_s26, 0 }
  0x12   : > { %p370_p2 = scmp.eq.s32.totalorder %s2979_s22, 1  ;;  %p375_p3 = scmp.ne.s32.totalorder %s2840_s19, %s2836_s18 }
  0x13   : > { %p376_p4 = scmp.eq.s32.totalorder %s2107_s23, 1  ;;  %p2108_p7 = scmp.ge.s32.totalorder %s2848_s21, 1 }
  0x14   : > { %s2994_s27 = scalar_select %p357_p1, %s2844_s20, %s359_s25  }
  0x15   : > { %p2996_p5 = por %p370_p2, %p369_p0  ;;  %p3000_p6 = por %p376_p4, %p375_p3 }
  0x16   : > { %3422 = sst [smem:[#allocation24_spill]] %s2994_s27  ;;  %p383_p8 = scmp.lt.s32.totalorder %s2848_s21, 3 }
  0x17   : > { %s3423_s28 = scalar_select %p2996_p5, 1, 0 }
  0x18   : > { %s3425_s29 = scalar_select %p3000_p6, 1, 0 }
  0x19   : > { %3424 = sst [smem:[#allocation25_spill]] %s3423_s28  ;;  %p3407_p9 = scmp.eq.s32.totalorder %s2979_s22, 0 }
  0x1a   : > { %3426 = sst [smem:[#allocation26_spill]] %s3425_s29  ;;  %p3007_p10 = pnand %p2108_p7, %p383_p8 }
  0x1b   : > { %s2850_s16 = smov [#allocation5]   ;;  %s2851_s25 = smov [#allocation8]  }
  0x1c   : > { %s3427_s30 = scalar_select %p3007_p10, 1, 0 }
  0x1d   : > { %s412_s17 = sshll.u32 %s2850_s16, 4  ;;  %p2293_p11 = pneg %p3007_p10  ;;  %s413_s17 = int_to_ptr.vmem [resolvable:$true] %s412_s17 }
  0x1e   : > { %s438_s26 = sshll.u32 %s2851_s25, 4  ;;  %s2602_s24 = scalar_lea.hbm %s3388_s4, 512  ;;  %s439_s26 = int_to_ptr.vmem [resolvable:$true] %s438_s26 }
  0x1f   : > { %p3015_p12 = pnand %p3407_p9, %p2293_p11  ;;  %p2603_p13 = scmp.ne.s32.totalorder %s3388_s4, %s2602_s24 }
  0x20   : > { %p2609_p3 = scmp.lt.u32.totalorder %s2602_s24, %s3388_s4 }
  0x21   : > { %p3027_p0 = pneg %p3015_p12 }
  0x23   : > { %p2605_p1 = pnand %p3027_p0, %p2603_p13 }
  0x25   : > { %p2606_p2 = pneg %p2605_p1 }
  0x27   : > { %p2611_p4 = pnand %p2609_p3, %p2606_p2 }
  0x29   : > { %2614 = shalt.err (!%p2611_p4)
}
  0x2a   : > { %s2615_s20 = scalar_lea.vmem %s413_s17, 512  ;;  %p2623_p9 = scmp.lt.s32.totalorder %s413_s17, %s413_s17 }
  0x2b   : > { %p2616_p7 = scmp.ne.s32.totalorder %s413_s17, %s2615_s20  ;;  %p2624_p6 = scmp.lt.s32.totalorder %s2615_s20, %s2615_s20 }
  0x2d   : > { %p2618_p8 = pnand %p2616_p7, %p3027_p0  ;;  %p2625_p5 = por %p2624_p6, %p2623_p9 }
  0x2f   : > { %p2619_p11 = pneg %p2618_p8 }
  0x31   : > { %p2626_p10 = pnand %p2625_p5, %p2619_p11 }
  0x33   : > { %2629 = shalt.err (!%p2626_p10)
}
  0x34   : > { %s2852_s18 = smov 256   ;;  %s2853_s27 = smov 16  }
  0x35   : > { %2299 = dma.hbm_to_vmem [thread:$0]  (!%p3015_p12), %s3388_s4, 512, %s413_s17, [#allocation6], %s2852_s18, %s2852_s18, %s2853_s27  }
  0x36   : > { %s2854_s24 = smov [#allocation2]   ;;  %s2630_s19 = scalar_lea.hbm %s3390_s6, 4096 }
  0x37   : > { %s402_s29 = sshll.u32 %s2854_s24, 4  ;;  %p2631_p5 = scmp.ne.s32.totalorder %s3390_s6, %s2630_s19  ;;  %s403_s29 = int_to_ptr.vmem [resolvable:$true] %s402_s29 }
  0x38   : > { %p2637_p10 = scmp.lt.u32.totalorder %s2630_s19, %s3390_s6 }
  0x39   : > { %p2633_p6 = pnand %p2631_p5, %p3027_p0 }
  0x3b   : > { %p2634_p9 = pneg %p2633_p6 }
  0x3d   : > { %p2639_p13 = pnand %p2637_p10, %p2634_p9 }
  0x3f   : > { %2642 = shalt.err (!%p2639_p13)
}
  0x40   : > { %s2643_s17 = scalar_lea.vmem %s439_s26, 4096  ;;  %p2651_p4 = scmp.lt.s32.totalorder %s439_s26, %s439_s26 }
  0x41   : > { %p2644_p1 = scmp.ne.s32.totalorder %s439_s26, %s2643_s17  ;;  %p2652_p7 = scmp.lt.s32.totalorder %s2643_s17, %s2643_s17 }
  0x43   : > { %p2646_p2 = pnand %p2644_p1, %p3027_p0  ;;  %p2653_p8 = por %p2652_p7, %p2651_p4 }
  0x45   : > { %p2647_p3 = pneg %p2646_p2 }
  0x47   : > { %p2654_p11 = pnand %p2653_p8, %p2647_p3 }
  0x49   : > { %2657 = shalt.err (!%p2654_p11)
}
  0x4a   : > { %s2855_s10 = smov 128   ;;  %s2856_s28 = smov 8  }
  0x4b   : > { %2305 = dma.hbm_to_vmem [thread:$0]  (!%p3015_p12), %s3390_s6, 4096, %s439_s26, [#allocation9], %s2855_s10, %s2855_s10, %s2856_s28  }
  0x4c   : > { %s2658_s27 = scalar_lea.hbm %s3387_s3, 64 }
  0x4d   : > { %p2659_p5 = scmp.ne.s32.totalorder %s3387_s3, %s2658_s27  ;;  %p2665_p10 = scmp.lt.u32.totalorder %s2658_s27, %s3387_s3 }
  0x4f   : > { %p2661_p6 = pnand %p2659_p5, %p3027_p0 }
  0x51   : > { %p2662_p9 = pneg %p2661_p6 }
  0x53   : > { %p2667_p13 = pnand %p2665_p10, %p2662_p9 }
  0x55   : > { %2670 = shalt.err (!%p2667_p13)
}
  0x56   : > { %s2671_s20 = scalar_lea.vmem %s403_s29, 64  ;;  %p2679_p4 = scmp.lt.s32.totalorder %s403_s29, %s403_s29 }
  0x57   : > { %p2672_p1 = scmp.ne.s32.totalorder %s403_s29, %s2671_s20  ;;  %p2680_p7 = scmp.lt.s32.totalorder %s2671_s20, %s2671_s20 }
  0x59   : > { %p2674_p2 = pnand %p2672_p1, %p3027_p0  ;;  %p2681_p8 = por %p2680_p7, %p2679_p4 }
  0x5b   : > { %p2675_p3 = pneg %p2674_p2 }
  0x5d   : > { %p2682_p11 = pnand %p2681_p8, %p2675_p3 }
  0x5f   : > { %2685 = shalt.err (!%p2682_p11)
}
  0x60   : > { %2296 = dma.hbm_to_vmem [thread:$0]  (!%p3015_p12), %s3387_s3, 64, %s403_s29, [#allocation3]  }
  0x61   : > { %s2857_s9 = smov [#allocation7]   ;;  %s2858_s19 = smov [#allocation10]  }
  0x62   : > { %s425_s12 = sshll.u32 %s2857_s9, 4  ;;  %s451_s18 = sshll.u32 %s2858_s19, 4  ;;  %s426_s12 = int_to_ptr.vmem [resolvable:$true] %s425_s12  ;;  %s452_s18 = int_to_ptr.vmem [resolvable:$true] %s451_s18 }
  0x63   : > { %s2686_s21 = scalar_lea.hbm %s3389_s5, 4096 }
  0x64   : > { %p2687_p5 = scmp.ne.s32.totalorder %s3389_s5, %s2686_s21  ;;  %p2693_p10 = scmp.lt.u32.totalorder %s2686_s21, %s3389_s5 }
  0x66   : > { %p2689_p6 = pnand %p2687_p5, %p3027_p0 }
  0x68   : > { %p2690_p9 = pneg %p2689_p6 }
  0x6a   : > { %p2695_p13 = pnand %p2693_p10, %p2690_p9 }
  0x6c   : > { %2698 = shalt.err (!%p2695_p13)
}
  0x6d   : > { %s2699_s29 = scalar_lea.vmem %s426_s12, 4096  ;;  %p2707_p4 = scmp.lt.s32.totalorder %s426_s12, %s426_s12 }
  0x6e   : > { %p2700_p1 = scmp.ne.s32.totalorder %s426_s12, %s2699_s29  ;;  %p2708_p7 = scmp.lt.s32.totalorder %s2699_s29, %s2699_s29 }
  0x70   : > { %p2702_p2 = pnand %p2700_p1, %p3027_p0  ;;  %p2709_p8 = por %p2708_p7, %p2707_p4 }
  0x72   : > { %p2703_p3 = pneg %p2702_p2 }
  0x74   : > { %p2710_p11 = pnand %p2709_p8, %p2703_p3 }
  0x76   : > { %2713 = shalt.err (!%p2710_p11)
}
  0x77   : > { %2302 = dma.hbm_to_vmem [thread:$0]  (!%p3015_p12), %s3389_s5, 4096, %s426_s12, [#allocation6], %s2855_s10, %s2855_s10, %s2856_s28  }
  0x78   : > { %s2714_s15 = scalar_lea.hbm %s3391_s7, 4096 }
  0x79   : > { %p2715_p5 = scmp.ne.s32.totalorder %s3391_s7, %s2714_s15  ;;  %p2721_p10 = scmp.lt.u32.totalorder %s2714_s15, %s3391_s7 }
  0x7b   : > { %p2717_p6 = pnand %p2715_p5, %p3027_p0 }
  0x7d   : > { %p2718_p9 = pneg %p2717_p6 }
  0x7f   : > { %p2723_p13 = pnand %p2721_p10, %p2718_p9 }
  0x81   : > { %2726 = shalt.err (!%p2723_p13)
}
  0x82   : > { %s2727_s26 = scalar_lea.vmem %s452_s18, 4096  ;;  %p2735_p4 = scmp.lt.s32.totalorder %s452_s18, %s452_s18 }
  0x83   : > { %p2728_p1 = scmp.ne.s32.totalorder %s452_s18, %s2727_s26  ;;  %p2736_p7 = scmp.lt.s32.totalorder %s2727_s26, %s2727_s26 }
  0x85   : > { %p2730_p2 = pnand %p2728_p1, %p3027_p0  ;;  %p2737_p8 = por %p2736_p7, %p2735_p4 }
  0x87   : > { %p2731_p3 = pneg %p2730_p2 }
  0x89   : > { %p2738_p11 = pnand %p2737_p8, %p2731_p3 }
  0x8b   : > { %2741 = shalt.err (!%p2738_p11)
}
  0x8c   : > { %2308 = dma.hbm_to_vmem [thread:$0]  (!%p3015_p12), %s3391_s7, 4096, %s452_s18, [#allocation9], %s2855_s10, %s2855_s10, %s2856_s28  }
  0x8d   : > { %s2859_s17 = smov [#allocation11]   ;;  %s2742_s15 = scalar_lea.hbm %s3392_s8, 4096 }
  0x8e   : > { %s464_s9 = sshll.u32 %s2859_s17, 4  ;;  %p2743_p5 = scmp.ne.s32.totalorder %s3392_s8, %s2742_s15  ;;  %s465_s9 = int_to_ptr.vmem [resolvable:$true] %s464_s9 }
  0x8f   : > { %p2749_p10 = scmp.lt.u32.totalorder %s2742_s15, %s3392_s8 }
  0x90   : > { %p2745_p6 = pnand %p2743_p5, %p3027_p0 }
  0x92   : > { %p2746_p9 = pneg %p2745_p6 }
  0x94   : > { %p2751_p13 = pnand %p2749_p10, %p2746_p9 }
  0x96   : > { %2754 = shalt.err (!%p2751_p13)
}
  0x97   : > { %s2755_s18 = scalar_lea.vmem %s465_s9, 4096  ;;  %p2763_p4 = scmp.lt.s32.totalorder %s465_s9, %s465_s9 }
  0x98   : > { %p2756_p1 = scmp.ne.s32.totalorder %s465_s9, %s2755_s18  ;;  %p2764_p7 = scmp.lt.s32.totalorder %s2755_s18, %s2755_s18 }
  0x9a   : > { %p2758_p2 = pnand %p2756_p1, %p3027_p0  ;;  %p2765_p8 = por %p2764_p7, %p2763_p4 }
  0x9c   : > { %p2759_p3 = pneg %p2758_p2 }
  0x9e   : > { %p2766_p11 = pnand %p2765_p8, %p2759_p3 }
  0xa0   : > { %2769 = shalt.err (!%p2766_p11)
}
  0xa1   : > { %2311 = dma.hbm_to_vmem [thread:$0]  (!%p3015_p12), %s3392_s8, 4096, %s465_s9, [#allocation12], %s2855_s10, %s2855_s10, %s2856_s28  }
  0xa2   : > { %p3430_p5 = scmp.ne.s32.totalorder %s3427_s30, 0 }
  0xa3   : > { %p3431_p0 = scmp.eq.s32.totalorder (!%p3430_p5), %s2979_s22, 0 }
  0xa4   : > { %506 = sbr.rel (%p3430_p5) target bundleno = 956 (0x3bc), region = 80 }
  0xab   : > { %2815 = dma.done.wait (%p3431_p0), [#allocation3], 64   ;;  %p3432_p6 = pmov %p3431_p0 }
  0xac   : > { %p3433_p9 = pmov %p3431_p0 }
  0xad   : > { %2817 = vsyncadd (%p3432_p6), [#allocation3], 4294967232 }
  0xae   : > { %2819 = dma.done.wait (%p3433_p9), [#allocation6], 4608   ;;  %p3434_p10 = pmov %p3431_p0 }
  0xaf   : > { %p3435_p13 = pmov %p3431_p0 }
  0xb0   : > { %2821 = vsyncadd (%p3434_p10), [#allocation6], 4294962688 }
  0xb1   : > { %2823 = dma.done.wait (%p3435_p13), [#allocation9], 8192   ;;  %p3436_p12 = pmov %p3431_p0 }
  0xb2   : > { %p3437_p1 = pmov %p3431_p0 }
  0xb3   : > { %2825 = vsyncadd (%p3436_p12), [#allocation9], 4294959104 }
  0xb4   : > { %2827 = dma.done.wait (%p3437_p1), [#allocation12], 4096   ;;  %p3438_p2 = pmov %p3431_p0 }
  0xb5   : > { %v2860_v0 = vmov 0   ;;  %v620_v1 = vld [vmem:[%s3385_s1] sm:$0xff]  ;;  %v2400_v4 = vld [vmem:[#allocation7 + $0x4] ss:$8 sps:$4 sm:$0xff]   ;;  %v2405_v7 = vld [vmem:[#allocation7 + $0x10] ss:$8 sps:$4 sm:$0xff]  }
  0xb6   : > { %2829 = vsyncadd (%p3438_p2), [#allocation12], 4294963200  ;;  %2388 = vset.pattern.permute.xlu0 %v2860_v0  ;;  %2389 = vset.pattern.permute.xlu1 %v2860_v0  ;;  %v628_v2 = vld [vmem:[%s3386_s2] sm:$0xff]  ;;  %v2406_v8 = vld [vmem:[#allocation7 + $0x24] ss:$8 sps:$4 sm:$0xff]   ;;  %v2861_v9 = vmov 1  }
  0xb7   : > { %v3171_v3 = vld [vmem:[#allocation2] sm:$0xf]  ;;  %623 = vperm.xlu0 %2388, %v620_v1   ;;  %v2402_v5 = vld [vmem:[#allocation7] ss:$8 sps:$4 sm:$0xff]   ;;  %1086 = vmatprep.subr.bf16.mxu1 %v2400_v4  ;;  %v2862_v11 = vmov 2   ;;  %v2863_v13 = vmov 6  }
  0xb8   : > { %665 = vperm.xlu1 %2389, %v3171_v3   ;;  %v2403_v6 = vld [vmem:[#allocation7 + $0x14] ss:$8 sps:$4 sm:$0xff]   ;;  %1087 = vmatpush1.bf16.msra.mxu1 %v2402_v5  ;;  %v2408_v10 = vld [vmem:[#allocation7 + $0x20] ss:$8 sps:$4 sm:$0xff]   ;;  %v2411_v14 = vld [vmem:[#allocation7 + $0x30] ss:$8 sps:$4 sm:$0xff]  }
  0xb9   : > { %1088 = vmatprep.subr.bf16.mxu1 %v2403_v6  ;;  %v2409_v12 = vld [vmem:[#allocation7 + $0x34] ss:$8 sps:$4 sm:$0xff]   ;;  %v2412_v15 = vld [vmem:[#allocation7 + $0x44] ss:$8 sps:$4 sm:$0xff]   ;;  %v2864_v16 = vmov 3   ;;  %v2865_v18 = vmov 7  }
  0xba   : > { %v2414_v17 = vld [vmem:[#allocation7 + $0x40] ss:$8 sps:$4 sm:$0xff]   ;;  %v2415_v19 = vld [vmem:[#allocation7 + $0x54] ss:$8 sps:$4 sm:$0xff]   ;;  %v2866_v20 = vmov 4   ;;  %v2867_v24 = vmov 5  }
  0xbb   : > { %631 = vperm.xlu0 %2388, %v628_v2   ;;  %v2417_v21 = vld [vmem:[#allocation7 + $0x50] ss:$8 sps:$4 sm:$0xff]   ;;  %v2418_v22 = vld [vmem:[#allocation7 + $0x64] ss:$8 sps:$4 sm:$0xff]   ;;  %v2420_v23 = vld [vmem:[#allocation7 + $0x60] ss:$8 sps:$4 sm:$0xff]  }
  0xbc   : > { %2390 = vset.pattern.permute.xlu1 %v2861_v9  ;;  %1089 = vmatpush1.bf16.msra.mxu1 %v2405_v7  ;;  %v2421_v25 = vld [vmem:[#allocation7 + $0x74] ss:$8 sps:$4 sm:$0xff]   ;;  %v2423_v26 = vld [vmem:[#allocation7 + $0x70] ss:$8 sps:$4 sm:$0xff]   ;;  %p574_p3 = scmp.lt.s32.totalorder %s2979_s22, 1  ;;  %v2868_v28 = vmov 8  }
  0xbd   : > { %693 = vperm.xlu1 %2390, %v3171_v3   ;;  %1090 = vmatprep.subr.bf16.mxu1 %v2406_v8  ;;  %v2424_v27 = vld [vmem:[#allocation7 + $0x84] ss:$8 sps:$4 sm:$0xff]   ;;  %v2426_v29 = vld [vmem:[#allocation7 + $0x80] ss:$8 sps:$4 sm:$0xff]   ;;  %v2427_v30 = vld [vmem:[#allocation7 + $0x94] ss:$8 sps:$4 sm:$0xff]  }
  0xbe   : > { %s575_s28 = scalar_select %p574_p3, %s2979_s22, 1  ;;  %v2429_v31 = vld [vmem:[#allocation7 + $0x90] ss:$8 sps:$4 sm:$0xff]   ;;  %v2430_v32 = vld [vmem:[#allocation7 + $0xa4] ss:$8 sps:$4 sm:$0xff]   ;;  %vm677_vm0 = vcmask 130048  }
  0xbf   : > { %2391 = vset.pattern.permute.xlu0 %v2862_v11  ;;  %v2432_v33 = vld [vmem:[#allocation7 + $0xa0] ss:$8 sps:$4 sm:$0xff]   ;;  %v2433_v34 = vld [vmem:[#allocation7 + $0xb4] ss:$8 sps:$4 sm:$0xff]   ;;  %v2435_v35 = vld [vmem:[#allocation7 + $0xb0] ss:$8 sps:$4 sm:$0xff]  }
  0xc0   : > { %721 = vperm.xlu0 %2391, %v3171_v3   ;;  %1091 = vmatpush1.bf16.msra.mxu1 %v2408_v10  ;;  %s2261_s29 = sshll.u32 %s575_s28, 4  ;;  %v2436_v37 = vld [vmem:[#allocation7 + $0xc4] ss:$8 sps:$4 sm:$0xff]   ;;  %v2438_v40 = vld [vmem:[#allocation7 + $0xc0] ss:$8 sps:$4 sm:$0xff]   ;;  %s2869_s27 = smov 16  }
  0xc1   : > { %2395 = vset.pattern.permute.xlu1 %v2863_v13  ;;  %1092 = vmatprep.subr.bf16.mxu1 %v2409_v12  ;;  %s578_s19 = scalar_lea.vmem %s3384_s0, %s2261_s29  ;;  %v2439_v42 = vld [vmem:[#allocation7 + $0xd4] ss:$8 sps:$4 sm:$0xff]   ;;  %v2441_v45 = vld [vmem:[#allocation7 + $0xd0] ss:$8 sps:$4 sm:$0xff]   ;;  %v2442_v47 = vld [vmem:[#allocation7 + $0xe4] ss:$8 sps:$4 sm:$0xff]  }
  0xc2   : > { %823 = vperm.xlu1 %2395, %v3171_v3   ;;  %v579_v36 = vld [vmem:[%s578_s19] sm:$0xff]  ;;  %v580_v38 = vld [vmem:[%s578_s19 + $0x8] sm:$0xff]  ;;  %v2447_v53 = vld [vmem:[#allocation7 + $0xf0] ss:$8 sps:$4 sm:$0xff]   ;;  %s2870_s15 = smov 17   ;;  %s2871_s21 = smov 127  }
  0xc3   : > { %v581_v39 = vrot.slane %v579_v36, 4  ;;  %v587_v41 = vrot.slane %v580_v38, 4  ;;  %v2444_v49 = vld [vmem:[#allocation7 + $0xe0] ss:$8 sps:$4 sm:$0xff]   ;;  %v2445_v51 = vld [vmem:[#allocation7 + $0xf4] ss:$8 sps:$4 sm:$0xff]  }
  0xc4   : > { %2392 = vset.pattern.permute.xlu0 %v2864_v16  ;;  %1093 = vmatpush1.bf16.msra.mxu1 %v2411_v14  ;;  %v2450_v55 = vld [vmem:[#allocation8 + $0x4] ss:$8 sps:$4 sm:$0xff]   ;;  %s2872_s24 = smov 113   ;;  %s2873_s25 = smov 15   ;;  %vm648_vm1 = vcmask 138240   ;;  %vm705_vm2 = vcmask 121856  }
  0xc5   : > { %749 = vperm.xlu0 %2392, %v3171_v3   ;;  %1094 = vmatprep.subr.bf16.mxu1 %v2412_v15  ;;  %v582_v43 = vadd.f32 %v581_v39, %v579_v36  ;;  %v588_v44 = vadd.f32 %v587_v41, %v580_v38  ;;  %v2462_v39 = vld [vmem:[#allocation8 + $0x44] ss:$8 sps:$4 sm:$0xff]   ;;  %s2874_s20 = smov 111   ;;  %s2875_s18 = smov 1   ;;  %v2463_v41 = vld [vmem:[#allocation8 + $0x50] ss:$8 sps:$4 sm:$0xff]  }
  0xc6   : > { %2396 = vset.pattern.permute.xlu1 %v2865_v18  ;;  %s2876_s26 = smov 112   ;;  %s3439_s9 = sld [smem:[#allocation29_spill]]  ;;  %vm733_vm3 = vcmask 7168   ;;  %vm778_vm4 = vcmask 1039360   ;;  %vm806_vm5 = vcmask 924672   ;;  %vm834_vm6 = vcmask 916480  }
  0xc7   : > { %851 = vperm.xlu1 %2396, %v3171_v3   ;;  %v583_v46 = vrot.slane %v582_v43, 2  ;;  %v589_v48 = vrot.slane %v588_v44, 2  ;;  %vm862_vm7 = vcmask 908288   ;;  %vm1850_vm8 = vcmask 1043456   ;;  %s3443_s12 = sld [smem:[#allocation25_spill]]  ;;  %s2262_s30 = sshll.u32 %s2979_s22, 8 }
  0xc8   : > { %1095 = vmatpush1.bf16.msra.mxu1 %v2414_v17  ;;  %s3444_s29 = sld [smem:[#allocation30_spill]]  ;;  %s2877_s19 = smov [#allocation13]  }
  0xc9   : > { %2393 = vset.pattern.permute.xlu0 %v2866_v20  ;;  %1096 = vmatprep.subr.bf16.mxu1 %v2415_v19  ;;  %v584_v50 = vadd.f32 %v583_v46, %v582_v43  ;;  %v590_v52 = vadd.f32 %v589_v48, %v588_v44  ;;  %v2466_v43 = vld [vmem:[#allocation8 + $0x60] ss:$8 sps:$4 sm:$0xff]   ;;  %v2471_v44 = vld [vmem:[#allocation8 + $0x74] ss:$8 sps:$4 sm:$0xff]   ;;  %v2474_v46 = vld [vmem:[#allocation8 + $0x84] ss:$8 sps:$4 sm:$0xff]  }
  0xca   : > { %767 = vperm.xlu0 %2393, %v3171_v3   ;;  %v2477_v48 = vld [vmem:[#allocation8 + $0x94] ss:$8 sps:$4 sm:$0xff]  }
  0xcb   : > { %2399 = vset.pattern.permute.xlu1 %v2860_v0  ;;  %v585_v54 = vrot.slane %v584_v50, 1  ;;  %v591_v56 = vrot.slane %v590_v52, 1 }
  0xcc   : > { %1097 = vmatpush1.bf16.msra.mxu1 %v2417_v21 }
  0xcd   : > { %1098 = vmatprep.subr.bf16.mxu1 %v2418_v22  ;;  %v586_v57 = vadd.f32 %v585_v54, %v584_v50  ;;  %v592_v58 = vadd.f32 %v591_v56, %v590_v52  ;;  %v2480_v50 = vld [vmem:[#allocation8 + $0xa4] ss:$8 sps:$4 sm:$0xff]   ;;  %v2483_v52 = vld [vmem:[#allocation8 + $0xb4] ss:$8 sps:$4 sm:$0xff]   ;;  %p3445_p7 = scmp.ne.s32.totalorder %s3443_s12, 0 }
  0xce   : > { %2394 = vset.pattern.permute.xlu0 %v2867_v24  ;;  %v2486_v54 = vld [vmem:[#allocation8 + $0xc4] ss:$8 sps:$4 sm:$0xff]   ;;  %v2489_v56 = vld [vmem:[#allocation8 + $0xd4] ss:$8 sps:$4 sm:$0xff]   ;;  %s3342_s17 = scalar_lea.hbm %s3444_s29, %s2262_s30 }
  0xcf   : > { %795 = vperm.xlu0 %2394, %v3171_v3   ;;  %v594_v59 = vmul.f32 0.125, %v586_v57  ;;  %v595_v60 = vmul.f32 0.125, %v592_v58  ;;  %v2487_v57 = vld [vmem:[#allocation8 + $0xd0] ss:$8 sps:$4 sm:$0xff]   ;;  %v2492_v58 = vld [vmem:[#allocation8 + $0xe4] ss:$8 sps:$4 sm:$0xff]  }
  0xd0   : > { %1099 = vmatpush1.bf16.msra.mxu1 %v2420_v23 }
  0xd1   : > { %1100 = vmatprep.subr.bf16.mxu1 %v2421_v25  ;;  %v596_v61 = vsub.f32 %v579_v36, %v594_v59  ;;  %v597_v62 = vsub.f32 %v580_v38, %v595_v60  ;;  %v2456_v36 = vld [vmem:[#allocation8 + $0x24] ss:$8 sps:$4 sm:$0xff]   ;;  %v2457_v38 = vld [vmem:[#allocation8 + $0x30] ss:$8 sps:$4 sm:$0xff]   ;;  %v2490_v59 = vld [vmem:[#allocation8 + $0xe0] ss:$8 sps:$4 sm:$0xff]  }
  0xd2   : > { %v2495_v60 = vld [vmem:[#allocation8 + $0xf4] ss:$8 sps:$4 sm:$0xff]  }
  0xd3   : > { %2397 = vset.pattern.permute.xlu0 %v2868_v28  ;;  %v598_v63 = vmul.f32 %v596_v61, %v596_v61  ;;  %v599_v1 = vmul.f32 %v597_v62, %v597_v62 }
  0xd4   : > { %1101 = vmatpush1.bf16.msra.mxu1 %v2423_v26 }
  0xd5   : > { %1102 = vmatprep.subr.bf16.mxu1 %v2424_v27  ;;  %v600_v2 = vrot.slane %v598_v63, 4  ;;  %v606_v4 = vrot.slane %v599_v1, 4 }
  0xd7   : > { %v601_v5 = vadd.f32 %v600_v2, %v598_v63  ;;  %v607_v6 = vadd.f32 %v606_v4, %v599_v1  ;;  %v2500_v63 = vld [vmem:[#allocation11] ss:$8 sps:$4 sm:$0xff]   ;;  %v2501_v1 = vld [vmem:[#allocation11 + $0x14] ss:$8 sps:$4 sm:$0xff]   ;;  %v2503_v2 = vld [vmem:[#allocation11 + $0x10] ss:$8 sps:$4 sm:$0xff]  }
  0xd8   : > { %1103 = vmatpush1.bf16.msra.mxu1 %v2426_v29  ;;  %v2504_v4 = vld [vmem:[#allocation11 + $0x24] ss:$8 sps:$4 sm:$0xff]  }
  0xd9   : > { %1104 = vmatprep.subr.bf16.mxu1 %v2427_v30  ;;  %v602_v7 = vrot.slane %v601_v5, 2  ;;  %v608_v8 = vrot.slane %v607_v6, 2 }
  0xdb   : > { %v603_v9 = vadd.f32 %v602_v7, %v601_v5  ;;  %v609_v10 = vadd.f32 %v608_v8, %v607_v6  ;;  %v2506_v5 = vld [vmem:[#allocation11 + $0x20] ss:$8 sps:$4 sm:$0xff]   ;;  %v2507_v6 = vld [vmem:[#allocation11 + $0x34] ss:$8 sps:$4 sm:$0xff]   ;;  %v2509_v7 = vld [vmem:[#allocation11 + $0x30] ss:$8 sps:$4 sm:$0xff]  }
  0xdc   : > { %1105 = vmatpush1.bf16.msra.mxu1 %v2429_v31  ;;  %v2448_v31 = vld [vmem:[#allocation8] ss:$8 sps:$4 sm:$0xff]   ;;  %v2510_v8 = vld [vmem:[#allocation11 + $0x44] ss:$8 sps:$4 sm:$0xff]  }
  0xdd   : > { %1106 = vmatprep.subr.bf16.mxu1 %v2430_v32  ;;  %v604_v11 = vrot.slane %v603_v9, 1  ;;  %v610_v12 = vrot.slane %v609_v10, 1 }
  0xdf   : > { %v605_v13 = vadd.f32 %v604_v11, %v603_v9  ;;  %v611_v14 = vadd.f32 %v610_v12, %v609_v10  ;;  %v2512_v9 = vld [vmem:[#allocation11 + $0x40] ss:$8 sps:$4 sm:$0xff]   ;;  %v2513_v10 = vld [vmem:[#allocation11 + $0x54] ss:$8 sps:$4 sm:$0xff]   ;;  %v2515_v11 = vld [vmem:[#allocation11 + $0x50] ss:$8 sps:$4 sm:$0xff]  }
  0xe0   : > { %1107 = vmatpush1.bf16.msra.mxu1 %v2432_v33  ;;  %v2516_v12 = vld [vmem:[#allocation11 + $0x64] ss:$8 sps:$4 sm:$0xff]  }
  0xe1   : > { %1108 = vmatprep.subr.bf16.mxu1 %v2433_v34  ;;  %v612_v15 = vmul.f32 0.125, %v605_v13  ;;  %v613_v16 = vmul.f32 0.125, %v611_v14  ;;  %v2453_v34 = vld [vmem:[#allocation8 + $0x14] ss:$8 sps:$4 sm:$0xff]   ;;  %v2518_v13 = vld [vmem:[#allocation11 + $0x60] ss:$8 sps:$4 sm:$0xff]  }
  0xe2   : > { %v2519_v14 = vld [vmem:[#allocation11 + $0x74] ss:$8 sps:$4 sm:$0xff]  }
  0xe3   : > { %v614_v17 = vadd.f32 1e-06, %v612_v15  ;;  %v615_v18 = vadd.f32 1e-06, %v613_v16  ;;  %v2521_v15 = vld [vmem:[#allocation11 + $0x70] ss:$8 sps:$4 sm:$0xff]  }
  0xe4   : > { %1109 = vmatpush1.bf16.msra.mxu1 %v2435_v35  ;;  %v2451_v35 = vld [vmem:[#allocation8 + $0x10] ss:$8 sps:$4 sm:$0xff]   ;;  %v2522_v16 = vld [vmem:[#allocation11 + $0x84] ss:$8 sps:$4 sm:$0xff]  }
  0xe5   : > { %1110 = vmatprep.subr.bf16.mxu1 %v2436_v37  ;;  %2594 = vrsqrt.f32 %v614_v17  ;;  %v2459_v37 = vld [vmem:[#allocation8 + $0x34] ss:$8 sps:$4 sm:$0xff]   ;;  %v2524_v17 = vld [vmem:[#allocation11 + $0x80] ss:$8 sps:$4 sm:$0xff]  }
  0xe6   : > { %2596 = vrsqrt.f32 %v615_v18  ;;  %v2525_v18 = vld [vmem:[#allocation11 + $0x94] ss:$8 sps:$4 sm:$0xff]  }
  0xe8   : > { %1111 = vmatpush1.bf16.msra.mxu1 %v2438_v40  ;;  %v2465_v40 = vld [vmem:[#allocation8 + $0x54] ss:$8 sps:$4 sm:$0xff]  }
  0xe9   : > { %1112 = vmatprep.subr.bf16.mxu1 %v2439_v42  ;;  %v2468_v42 = vld [vmem:[#allocation8 + $0x64] ss:$8 sps:$4 sm:$0xff]  }
  0xec   : > { %1113 = vmatpush1.bf16.msra.mxu1 %v2441_v45  ;;  %v2469_v45 = vld [vmem:[#allocation8 + $0x70] ss:$8 sps:$4 sm:$0xff]  }
  0xed   : > { %1114 = vmatprep.subr.bf16.mxu1 %v2442_v47  ;;  %v2472_v47 = vld [vmem:[#allocation8 + $0x80] ss:$8 sps:$4 sm:$0xff]  }
  0xef   : > { %v2595_v19 = vpop.eup %2594 }
  0xf0   : > { %1115 = vmatpush1.bf16.msra.mxu1 %v2444_v49  ;;  %v2597_v20 = vpop.eup %2596  ;;  %v618_v21 = vmul.f32 %v2595_v19, %v596_v61  ;;  %v2475_v49 = vld [vmem:[#allocation8 + $0x90] ss:$8 sps:$4 sm:$0xff]  }
  0xf1   : > { %1116 = vmatprep.subr.bf16.mxu1 %v2445_v51  ;;  %v619_v22 = vmul.f32 %v2597_v20, %v597_v62  ;;  %v2478_v51 = vld [vmem:[#allocation8 + $0xa0] ss:$8 sps:$4 sm:$0xff]   ;;  %v2493_v61 = vld [vmem:[#allocation8 + $0xf0] ss:$8 sps:$4 sm:$0xff]   ;;  %v2498_v62 = vld [vmem:[#allocation11 + $0x4] ss:$8 sps:$4 sm:$0xff]  }
  0xf2   : > { %1608 = vmatprep.subr.bf16.mxu0 %v2498_v62  ;;  %v2527_v19 = vld [vmem:[#allocation11 + $0x90] ss:$8 sps:$4 sm:$0xff]   ;;  %v2528_v20 = vld [vmem:[#allocation11 + $0xa4] ss:$8 sps:$4 sm:$0xff]   ;;  %v2546_v62 = vld [vmem:[#allocation10] ss:$8 sps:$4 sm:$0xff]  }
  0xf3   : > { %1609 = vmatpush1.bf16.msra.mxu0 %v2500_v63 }
  0xf4   : > { %1117 = vmatpush1.bf16.msra.mxu1 %v2447_v53  ;;  %v2481_v53 = vld [vmem:[#allocation8 + $0xb0] ss:$8 sps:$4 sm:$0xff]   ;;  %1610 = vmatprep.subr.bf16.mxu0 %v2501_v1  ;;  %v2551_v1 = vld [vmem:[#allocation10 + $0x14] ss:$8 sps:$4 sm:$0xff]  }
  0xf5   : > { %1319 = vmatprep.subr.bf16.mxu1 %v2450_v55  ;;  %v2484_v55 = vld [vmem:[#allocation8 + $0xc0] ss:$8 sps:$4 sm:$0xff]  }
  0xf7   : > { %1611 = vmatpush1.bf16.msra.mxu0 %v2503_v2 }
  0xf8   : > { %1612 = vmatprep.subr.bf16.mxu0 %v2504_v4  ;;  %v2549_v4 = vld [vmem:[#allocation10 + $0x10] ss:$8 sps:$4 sm:$0xff]  }
  0xfb   : > { %1613 = vmatpush1.bf16.msra.mxu0 %v2506_v5  ;;  %v2554_v5 = vld [vmem:[#allocation10 + $0x24] ss:$8 sps:$4 sm:$0xff]  }
  0xfc   : > { %1614 = vmatprep.subr.bf16.mxu0 %v2507_v6  ;;  %v2552_v6 = vld [vmem:[#allocation10 + $0x20] ss:$8 sps:$4 sm:$0xff]  }
  0xff   : > { %1615 = vmatpush1.bf16.msra.mxu0 %v2509_v7  ;;  %v2557_v7 = vld [vmem:[#allocation10 + $0x34] ss:$8 sps:$4 sm:$0xff]  }
 0x100   : > { %1616 = vmatprep.subr.bf16.mxu0 %v2510_v8  ;;  %v2555_v8 = vld [vmem:[#allocation10 + $0x30] ss:$8 sps:$4 sm:$0xff]  }
 0x103   : > { %1617 = vmatpush1.bf16.msra.mxu0 %v2512_v9  ;;  %v2560_v9 = vld [vmem:[#allocation10 + $0x44] ss:$8 sps:$4 sm:$0xff]  }
 0x104   : > { %1618 = vmatprep.subr.bf16.mxu0 %v2513_v10  ;;  %v2558_v10 = vld [vmem:[#allocation10 + $0x40] ss:$8 sps:$4 sm:$0xff]  }
 0x107   : > { %1619 = vmatpush1.bf16.msra.mxu0 %v2515_v11  ;;  %v2563_v11 = vld [vmem:[#allocation10 + $0x54] ss:$8 sps:$4 sm:$0xff]  }
 0x108   : > { %1620 = vmatprep.subr.bf16.mxu0 %v2516_v12  ;;  %v2561_v12 = vld [vmem:[#allocation10 + $0x50] ss:$8 sps:$4 sm:$0xff]  }
 0x10b   : > { %1621 = vmatpush1.bf16.msra.mxu0 %v2518_v13  ;;  %v2566_v13 = vld [vmem:[#allocation10 + $0x64] ss:$8 sps:$4 sm:$0xff]  }
 0x10c   : > { %1622 = vmatprep.subr.bf16.mxu0 %v2519_v14  ;;  %v2564_v14 = vld [vmem:[#allocation10 + $0x60] ss:$8 sps:$4 sm:$0xff]  }
 0x10f   : > { %1623 = vmatpush1.bf16.msra.mxu0 %v2521_v15  ;;  %v2569_v15 = vld [vmem:[#allocation10 + $0x74] ss:$8 sps:$4 sm:$0xff]  }
 0x110   : > { %1624 = vmatprep.subr.bf16.mxu0 %v2522_v16  ;;  %v2567_v16 = vld [vmem:[#allocation10 + $0x70] ss:$8 sps:$4 sm:$0xff]  }
 0x113   : > { %1625 = vmatpush1.bf16.msra.mxu0 %v2524_v17  ;;  %v2572_v17 = vld [vmem:[#allocation10 + $0x84] ss:$8 sps:$4 sm:$0xff]  }
 0x114   : > { %1626 = vmatprep.subr.bf16.mxu0 %v2525_v18  ;;  %v2570_v18 = vld [vmem:[#allocation10 + $0x80] ss:$8 sps:$4 sm:$0xff]  }
 0x117   : > { %1627 = vmatpush1.bf16.msra.mxu0 %v2527_v19  ;;  %v2575_v19 = vld [vmem:[#allocation10 + $0x94] ss:$8 sps:$4 sm:$0xff]  }
 0x118   : > { %1628 = vmatprep.subr.bf16.mxu0 %v2528_v20  ;;  %v2573_v20 = vld [vmem:[#allocation10 + $0x90] ss:$8 sps:$4 sm:$0xff]  }
 0x136   : > { %v624_v23 = vpop.permute.xlu0 %623 }
 0x137   : > { %v626_v24 = vmul.f32 %v624_v23, %v618_v21  ;;  %v627_v25 = vmul.f32 %v624_v23, %v619_v22  ;;  %v2530_v21 = vld [vmem:[#allocation11 + $0xa0] ss:$8 sps:$4 sm:$0xff]   ;;  %v2531_v22 = vld [vmem:[#allocation11 + $0xb4] ss:$8 sps:$4 sm:$0xff]   ;;  %v2533_v23 = vld [vmem:[#allocation11 + $0xb0] ss:$8 sps:$4 sm:$0xff]  }
 0x138   : > { %1629 = vmatpush1.bf16.msra.mxu0 %v2530_v21  ;;  %v2578_v21 = vld [vmem:[#allocation10 + $0xa4] ss:$8 sps:$4 sm:$0xff]  }
 0x139   : > { %1630 = vmatprep.subr.bf16.mxu0 %v2531_v22  ;;  %v2576_v22 = vld [vmem:[#allocation10 + $0xa0] ss:$8 sps:$4 sm:$0xff]  }
 0x13a   : > { %v632_v26 = vpop.permute.xlu0 %631 }
 0x13b   : > { %v3187_v27 = vadd.f32 %v632_v26, %v626_v24  ;;  %v3189_v28 = vadd.f32 %v632_v26, %v627_v25  ;;  %v2534_v24 = vld [vmem:[#allocation11 + $0xc4] ss:$8 sps:$4 sm:$0xff]   ;;  %v2536_v25 = vld [vmem:[#allocation11 + $0xc0] ss:$8 sps:$4 sm:$0xff]   ;;  %v2537_v26 = vld [vmem:[#allocation11 + $0xd4] ss:$8 sps:$4 sm:$0xff]  }
 0x13c   : > { %1631 = vmatpush1.bf16.msra.mxu0 %v2533_v23  ;;  %v2581_v23 = vld [vmem:[#allocation10 + $0xb4] ss:$8 sps:$4 sm:$0xff]  }
 0x13d   : > { %672 = vrot.lane.b32.xlu0 %v3189_v28, %s2869_s27  ;;  %642 = vrot.lane.b32.xlu1 %v3189_v28, %s2870_s15  ;;  %v887_v29 = vpack.c.bf16 %v3189_v28, %v3189_v28  ;;  %v886_v30 = vpack.c.bf16 %v3187_v27, %v3187_v27 }
 0x13e   : > { %1632 = vmatprep.subr.bf16.mxu0 %v2534_v24  ;;  %v2579_v24 = vld [vmem:[#allocation10 + $0xb0] ss:$8 sps:$4 sm:$0xff]  }
 0x13f   : > { %v923_v32 = vrot.slane %v887_v29, 2  ;;  %v3197_v33 = vrot.slane %v886_v30, 2  ;;  %v2539_v29 = vld [vmem:[#allocation11 + $0xd0] ss:$8 sps:$4 sm:$0xff]   ;;  %v2540_v30 = vld [vmem:[#allocation11 + $0xe4] ss:$8 sps:$4 sm:$0xff]  }
 0x140   : > { %1633 = vmatpush1.bf16.msra.mxu0 %v2536_v25  ;;  %v2584_v25 = vld [vmem:[#allocation10 + $0xc4] ss:$8 sps:$4 sm:$0xff]  }
 0x141   : > { %879 = vperm.xlu0 %2397, %v3171_v3   ;;  %1118 = vmatprep.mubr.bf16.mxu1 %v923_v32  ;;  %v2454_v3 = vld [vmem:[#allocation8 + $0x20] ss:$8 sps:$4 sm:$0xff]  }
 0x142   : > { %646 = vrot.lane.b32.xlu1 %v3187_v27, %s2870_s15  ;;  %1119 = vmatmul.mubr.bf16.vlgmr.msra.gmra.mrb[0].mxu1 %v3197_v33  ;;  %s3440_s15 = sld [smem:[#allocation27_spill]] }
 0x143   : > { %1320 = vmatpush1.bf16.msra.mxu1 %v2448_v31  ;;  %1351 = vmatprep.mubr.bf16.mxu1 %v923_v32  ;;  %v2542_v31 = vld [vmem:[#allocation11 + $0xe0] ss:$8 sps:$4 sm:$0xff]   ;;  %v2543_v32 = vld [vmem:[#allocation11 + $0xf4] ss:$8 sps:$4 sm:$0xff]  }
 0x144   : > { %1321 = vmatprep.subr.bf16.mxu1 %v2453_v34  ;;  %1634 = vmatprep.subr.bf16.mxu0 %v2537_v26  ;;  %v2548_v34 = vld [vmem:[#allocation10 + $0x4] ss:$8 sps:$4 sm:$0xff]   ;;  %v2582_v26 = vld [vmem:[#allocation10 + $0xc0] ss:$8 sps:$4 sm:$0xff]  }
 0x145   : > { %776 = vrot.lane.b32.xlu0 %v3189_v28, %s2871_s21  ;;  %1635 = vmatpush1.bf16.msra.mxu0 %v2539_v29  ;;  %v2587_v29 = vld [vmem:[#allocation10 + $0xd4] ss:$8 sps:$4 sm:$0xff]  }
 0x146   : > { %675 = vrot.lane.b32.xlu1 %v3187_v27, %s2869_s27  ;;  %2398 = vset.pattern.permute.xlu0 %v2860_v0  ;;  %v2460_v0 = vld [vmem:[#allocation8 + $0x40] ss:$8 sps:$4 sm:$0xff]   ;;  %s2774_s27 = sshll.u32 %s2877_s19, 4  ;;  %s2775_s27 = int_to_ptr.vmem [resolvable:$false] %s2774_s27 }
 0x147   : > { %1322 = vmatpush1.bf16.msra.mxu1 %v2451_v35  ;;  %1636 = vmatprep.subr.bf16.mxu0 %v2540_v30  ;;  %v2585_v30 = vld [vmem:[#allocation10 + $0xd0] ss:$8 sps:$4 sm:$0xff]  }
 0x148   : > { %1323 = vmatprep.subr.bf16.mxu1 %v2456_v36 }
 0x149   : > { %802 = vrot.lane.b32.xlu0 %v3187_v27, %s2872_s24  ;;  %1637 = vmatpush1.bf16.msra.mxu0 %v2542_v31  ;;  %v2590_v31 = vld [vmem:[#allocation10 + $0xe4] ss:$8 sps:$4 sm:$0xff]  }
 0x14a   : > { %700 = vrot.lane.b32.xlu1 %v3189_v28, %s2873_s25  ;;  %1638 = vmatprep.subr.bf16.mxu0 %v2543_v32  ;;  %v2588_v32 = vld [vmem:[#allocation10 + $0xe0] ss:$8 sps:$4 sm:$0xff]  }
 0x14b   : > { %1324 = vmatpush1.bf16.msra.mxu1 %v2454_v3 }
 0x14c   : > { %1325 = vmatprep.subr.bf16.mxu1 %v2459_v37 }
 0x14d   : > { %858 = vrot.lane.b32.xlu0 %v3187_v27, %s2874_s20 }
 0x14e   : > { %703 = vrot.lane.b32.xlu1 %v3187_v27, %s2873_s25  ;;  %s3441_s25 = sld [smem:[#allocation28_spill]] }
 0x14f   : > { %1326 = vmatpush1.bf16.msra.mxu1 %v2457_v38  ;;  %v1927_v38 = vld [vmem:[%s3395_s11] sm:$0xf] }
 0x150   : > { %1327 = vmatprep.subr.bf16.mxu1 %v2462_v39  ;;  %v1945_v39 = vld [vmem:[%s3397_s13] sm:$0xf] }
 0x151   : > { %1932 = vperm.xlu0 %2398, %v1927_v38  }
 0x152   : > { %728 = vrot.lane.b32.xlu1 %v3189_v28, %s2875_s18 }
 0x153   : > { %1328 = vmatpush1.bf16.msra.mxu1 %v2460_v0  ;;  %v1955_v0 = vld [vmem:[%s3398_s14] sm:$0xf] }
 0x154   : > { %1329 = vmatprep.subr.bf16.mxu1 %v2465_v40  ;;  %v1937_v40 = vld [vmem:[%s3439_s9] sm:$0xf] }
 0x155   : > { %1958 = vperm.xlu0 %2398, %v1955_v0  }
 0x156   : > { %731 = vrot.lane.b32.xlu1 %v3187_v27, %s2875_s18 }
 0x157   : > { %1330 = vmatpush1.bf16.msra.mxu1 %v2463_v41  ;;  %v1360_v41 = vld [vmem:[%s3440_s15] sm:$0xff]  ;;  %s2776_s15 = scalar_lea.vmem %s2775_s27, 512 }
 0x158   : > { %1331 = vmatprep.subr.bf16.mxu1 %v2468_v42  ;;  %v1361_v42 = vld [vmem:[%s3441_s25] sm:$0xff] }
 0x15a   : > { %774 = vrot.lane.b32.xlu1 %v3187_v27, %s2871_s21 }
 0x15b   : > { %1332 = vmatpush1.bf16.msra.mxu1 %v2466_v43  ;;  %v1363_v43 = vcombine.high %v1360_v41, %v1360_v41 }
 0x15c   : > { %1333 = vmatprep.subr.bf16.mxu1 %v2471_v44  ;;  %v1368_v44 = vcombine.high %v1361_v42, %v1361_v42 }
 0x15e   : > { %804 = vrot.lane.b32.xlu1 %v3189_v28, %s2872_s24 }
 0x15f   : > { %1334 = vmatpush1.bf16.msra.mxu1 %v2469_v45 }
 0x160   : > { %1335 = vmatprep.subr.bf16.mxu1 %v2474_v46 }
 0x162   : > { %830 = vrot.lane.b32.xlu1 %v3187_v27, %s2876_s26 }
 0x163   : > { %1336 = vmatpush1.bf16.msra.mxu1 %v2472_v47 }
 0x164   : > { %1337 = vmatprep.subr.bf16.mxu1 %v2477_v48 }
 0x166   : > { %832 = vrot.lane.b32.xlu1 %v3189_v28, %s2876_s26 }
 0x167   : > { %1338 = vmatpush1.bf16.msra.mxu1 %v2475_v49 }
 0x168   : > { %1339 = vmatprep.subr.bf16.mxu1 %v2480_v50 }
 0x16a   : > { %860 = vrot.lane.b32.xlu1 %v3189_v28, %s2874_s20  ;;  %s3442_s20 = sld [smem:[#allocation20_spill]] }
 0x16b   : > { %1340 = vmatpush1.bf16.msra.mxu1 %v2478_v51 }
 0x16c   : > { %1341 = vmatprep.subr.bf16.mxu1 %v2483_v52 }
 0x16e   : > { %1950 = vperm.xlu1 %2399, %v1945_v39  }
 0x16f   : > { %1342 = vmatpush1.bf16.msra.mxu1 %v2481_v53 }
 0x170   : > { %1343 = vmatprep.subr.bf16.mxu1 %v2486_v54  ;;  %s571_s18 = sand.u32 1, %s3442_s20  }
 0x171   : > { %s2123_s26 = sshll.u32 %s571_s18, 4  ;;  %s1974_s9 = scalar_lea.sflag [#allocation4], %s571_s18 }
 0x172   : > { %1940 = vperm.xlu1 %2399, %v1937_v40   ;;  %s573_s23 = scalar_lea.vmem [#allocation13], %s2123_s26 }
 0x173   : > { %1344 = vmatpush1.bf16.msra.mxu1 %v2484_v55  ;;  %s1988_s16 = sshll.u32 %s573_s23, 4  ;;  %s3344_s16 = int_to_ptr.vmem [resolvable:$true] %s1988_s16 }
 0x174   : > { %1345 = vmatprep.subr.bf16.mxu1 %v2489_v56  ;;  %s2770_s22 = scalar_lea.vmem %s3344_s16, 256  ;;  %p2777_p5 = scmp.lt.s32.totalorder %s3344_s16, %s2775_s27 }
 0x175   : > { %p2771_p4 = scmp.ne.s32.totalorder %s3344_s16, %s2770_s22  ;;  %p2778_p0 = scmp.lt.s32.totalorder %s2776_s15, %s2770_s22 }
 0x177   : > { %1346 = vmatpush1.bf16.msra.mxu1 %v2487_v57  ;;  %p2772_p8 = pnand %p2771_p4, %p3445_p7  ;;  %p2779_p6 = por %p2778_p0, %p2777_p5 }
 0x178   : > { %1347 = vmatprep.subr.bf16.mxu1 %v2492_v58 }
 0x179   : > { %p2773_p11 = pneg %p2772_p8 }
 0x17b   : > { %1348 = vmatpush1.bf16.msra.mxu1 %v2490_v59  ;;  %p2780_p9 = pnand %p2779_p6, %p2773_p11 }
 0x17c   : > { %1349 = vmatprep.subr.bf16.mxu1 %v2495_v60 }
 0x17f   : > { %1350 = vmatpush1.bf16.msra.mxu1 %v2493_v61 }
 0x182   : > { %1352 = vmatmul.mubr.bf16.vlgmr.msra.gmra.mrb[4].mxu1 %v3197_v33  ;;  %v2545_v33 = vld [vmem:[#allocation11 + $0xf0] ss:$8 sps:$4 sm:$0xff]  }
 0x183   : > { %1639 = vmatpush1.bf16.msra.mxu0 %v2545_v33  ;;  %v2593_v33 = vld [vmem:[#allocation10 + $0xf4] ss:$8 sps:$4 sm:$0xff]  }
 0x184   : > { %1809 = vmatprep.subr.bf16.mxu0 %v2548_v34  ;;  %v2591_v34 = vld [vmem:[#allocation10 + $0xf0] ss:$8 sps:$4 sm:$0xff]  }
 0x215   : > { %v1120_v35 = vpop.f32.mrb[0].mxu1 }
 0x216   : > { %v1122_v36 = vpop.f32.mrb[1].mxu1  ;;  %v1365_v46 = vmul.f32 %v1360_v41, %v1120_v35  ;;  %v1374_v47 = vmul.f32 %v1361_v42, %v1120_v35 }
 0x217   : > { %v1124_v3 = vpop.f32.mrb[2].mxu1  ;;  %v1366_v51 = vmul.f32 %v1363_v43, %v1122_v36  ;;  %v1375_v52 = vmul.f32 %v1368_v44, %v1122_v36  ;;  %v3245_v36 = vpop.permute.xlu1 %665 }
 0x218   : > { %v1125_v37 = vpop.f32.mrb[3].mxu1 }
 0x21b   : > { %v694_v3 = vpop.permute.xlu1 %693 }
 0x21f   : > { %v3247_v37 = vpop.permute.xlu1 %823 }
 0x223   : > { %v3249_v38 = vpop.permute.xlu1 %851 }
 0x227   : > { %v643_v39 = vpop.permute.xlu1 %642 }
 0x22b   : > { %v647_v0 = vpop.permute.xlu1 %646 }
 0x22f   : > { %v676_v40 = vpop.permute.xlu1 %675 }
 0x255   : > { %v1353_v45 = vpop.f32.mrb[4].mxu1 }
 0x256   : > { %v1370_v48 = vmul.f32 %v1361_v42, %v1353_v45  ;;  %v1376_v49 = vmul.f32 %v1360_v41, %v1353_v45  ;;  %v1355_v50 = vpop.f32.mrb[5].mxu1  ;;  %v701_v41 = vpop.permute.xlu1 %700 }
 0x257   : > { %v1371_v53 = vmul.f32 %v1368_v44, %v1355_v50  ;;  %v1377_v54 = vmul.f32 %v1363_v43, %v1355_v50  ;;  %v1357_v55 = vpop.f32.mrb[6].mxu1  ;;  %v3251_v42 = vpop.permute.xlu0 %721 }
 0x258   : > { %v3241_v56 = vsub.f32 %v1365_v46, %v1370_v48  ;;  %v1378_v57 = vadd.f32 %v1376_v49, %v1374_v47  ;;  %v1358_v58 = vpop.f32.mrb[7].mxu1  ;;  %v653_v48 = vlaneseq }
 0x259   : > { %v1373_v59 = vsub.f32 %v1366_v51, %v1371_v53  ;;  %v1379_v60 = vadd.f32 %v1377_v54, %v1375_v52  ;;  %v3270_v58 = vld [vmem:[#allocation5 + $0x8] sm:$0xff] }
 0x25a   : > { %v1414_v63 = vpack.c.bf16 %v1378_v57, %v1378_v57  ;;  %v1380_v35 = vpack.c.bf16 %v3241_v56, %v3241_v56  ;;  %v704_v43 = vpop.permute.xlu1 %703  ;;  %v3261_v51 = vshrl.u32 %v653_v48, 7  ;;  %v3268_v57 = vld [vmem:[#allocation5] sm:$0xff] }
 0x25b   : > { %v1415_v61 = vpack.c.bf16 %v1379_v60, %v1379_v60  ;;  %v1381_v2 = vpack.c.bf16 %v1373_v59, %v1373_v59  ;;  %v3253_v44 = vpop.permute.xlu0 %749 }
 0x25c   : > { %v684_v53 = vsub.s32 1, %v3261_v51  ;;  %v655_v54 = vsub.s32 0, %v3261_v51  ;;  %v712_v55 = vsub.s32 2, %v3261_v51 }
 0x25d   : > { %1640 = vmatprep.mubr.bf16.mxu0 %v1415_v61  ;;  %v740_v61 = vsub.s32 3, %v3261_v51 }
 0x25e   : > { %1641 = vmatmul.mubr.bf16.vlgmr.msra.gmra.mrb[0].mxu0 %v1414_v63  ;;  %v729_v45 = vpop.permute.xlu1 %728  ;;  %v685_v59 = vrot.slane %v3268_v57, %v684_v53  ;;  %v689_v63 = vrot.slane %v3270_v58, %v684_v53 }
 0x25f   : > { %1810 = vmatpush1.bf16.msra.mxu0 %v2546_v62  ;;  %1841 = vmatprep.mubr.bf16.mxu0 %v1381_v2  ;;  %v3255_v46 = vpop.permute.xlu0 %767  ;;  %v758_v62 = vsub.s32 4, %v3261_v51  ;;  %v656_v2 = vrot.slane %v3268_v57, %v655_v54 }
 0x260   : > { %1811 = vmatprep.subr.bf16.mxu0 %v2551_v1 }
 0x262   : > { %v732_v47 = vpop.permute.xlu1 %731 }
 0x263   : > { %1812 = vmatpush1.bf16.msra.mxu0 %v2549_v4  ;;  %v3257_v49 = vpop.permute.xlu0 %795 }
 0x264   : > { %1813 = vmatprep.subr.bf16.mxu0 %v2554_v5  ;;  %v713_v5 = vrot.slane %v3268_v57, %v712_v55 }
 0x266   : > { %v3259_v50 = vpop.permute.xlu1 %774 }
 0x267   : > { %1814 = vmatpush1.bf16.msra.mxu0 %v2552_v6  ;;  %v673_v52 = vpop.permute.xlu0 %672  ;;  %v660_v6 = vrot.slane %v3270_v58, %v655_v54 }
 0x268   : > { %1815 = vmatprep.subr.bf16.mxu0 %v2557_v7  ;;  %v681_v1 = vsel %vm677_vm0, %v673_v52, %v676_v40  ;;  %v678_v4 = vsel %vm677_vm0, %v676_v40, %v673_v52  ;;  %v652_v7 = vsel %vm648_vm1, %v643_v39, %v647_v0 }
 0x26a   : > { %v3266_v56 = vpop.permute.xlu1 %804 }
 0x26b   : > { %1816 = vmatpush1.bf16.msra.mxu0 %v2555_v8  ;;  %v3273_v60 = vpop.permute.xlu0 %879  ;;  %v717_v8 = vrot.slane %v3270_v58, %v712_v55 }
 0x26c   : > { %1817 = vmatprep.subr.bf16.mxu0 %v2560_v9  ;;  %v709_v9 = vsel %vm705_vm2, %v701_v41, %v704_v43 }
 0x26f   : > { %1818 = vmatpush1.bf16.msra.mxu0 %v2558_v10  ;;  %v649_v10 = vsel %vm648_vm1, %v647_v0, %v643_v39  ;;  %v814_v39 = vsub.s32 6, %v3261_v51 }
 0x270   : > { %1819 = vmatprep.subr.bf16.mxu0 %v2563_v11  ;;  %v690_v11 = vmul.f32 %v685_v59, %v681_v1 }
 0x271   : > { %v819_v59 = vrot.slane %v3270_v58, %v814_v39 }
 0x273   : > { %1820 = vmatpush1.bf16.msra.mxu0 %v2561_v12  ;;  %v706_v12 = vsel %vm705_vm2, %v704_v43, %v701_v41 }
 0x274   : > { %1821 = vmatprep.subr.bf16.mxu0 %v2566_v13  ;;  %v741_v13 = vrot.slane %v3268_v57, %v740_v61 }
 0x277   : > { %1822 = vmatpush1.bf16.msra.mxu0 %v2564_v14  ;;  %v831_v14 = vpop.permute.xlu1 %830 }
 0x278   : > { %1823 = vmatprep.subr.bf16.mxu0 %v2569_v15  ;;  %v759_v15 = vrot.slane %v3268_v57, %v758_v62 }
 0x27b   : > { %1824 = vmatpush1.bf16.msra.mxu0 %v2567_v16  ;;  %v691_v16 = vmul.f32 %v689_v63, %v678_v4  ;;  %v833_v0 = vpop.permute.xlu1 %832 }
 0x27c   : > { %1825 = vmatprep.subr.bf16.mxu0 %v2572_v17  ;;  %v745_v17 = vrot.slane %v3270_v58, %v740_v61 }
 0x27f   : > { %1826 = vmatpush1.bf16.msra.mxu0 %v2570_v18  ;;  %v737_v18 = vsel %vm733_vm3, %v729_v45, %v732_v47 }
 0x280   : > { %1827 = vmatprep.subr.bf16.mxu0 %v2575_v19  ;;  %v661_v19 = vmul.f32 %v656_v2, %v652_v7  ;;  %v861_v2 = vpop.permute.xlu1 %860 }
 0x283   : > { %1828 = vmatpush1.bf16.msra.mxu0 %v2573_v20  ;;  %v718_v20 = vmul.f32 %v713_v5, %v709_v9 }
 0x284   : > { %1829 = vmatprep.subr.bf16.mxu0 %v2578_v21  ;;  %v777_v21 = vpop.permute.xlu0 %776 }
 0x287   : > { %1830 = vmatpush1.bf16.msra.mxu0 %v2576_v22  ;;  %v734_v22 = vsel %vm733_vm3, %v732_v47, %v729_v45  ;;  %v842_v45 = vsub.s32 7, %v3261_v51 }
 0x288   : > { %1831 = vmatprep.subr.bf16.mxu0 %v2581_v23  ;;  %v763_v23 = vrot.slane %v3270_v58, %v758_v62 }
 0x289   : > { %v843_v62 = vrot.slane %v3268_v57, %v842_v45 }
 0x28a   : > { %v765_v40 = vmul.f32 %v763_v23, %v3189_v28  ;;  %v779_v28 = vsel %vm778_vm4, %v3259_v50, %v777_v21 }
 0x28b   : > { %1832 = vmatpush1.bf16.msra.mxu0 %v2579_v24  ;;  %v662_v24 = vmul.f32 %v660_v6, %v649_v10  ;;  %v835_v6 = vsel %vm834_vm6, %v831_v14, %v833_v0  ;;  %v839_v10 = vsel %vm834_vm6, %v833_v0, %v831_v14 }
 0x28c   : > { %1833 = vmatprep.subr.bf16.mxu0 %v2584_v25  ;;  %v719_v25 = vmul.f32 %v717_v8, %v706_v12  ;;  %v2126_v12 = vld [vmem:[#allocation5 + $0x10] ss:$0 sm:$0xff] }
 0x28d   : > { %v669_v41 = vmul.f32 %v3245_v36, %v662_v24 }
 0x28e   : > { %v725_v43 = vmul.f32 %v3251_v42, %v719_v25 }
 0x28f   : > { %1834 = vmatpush1.bf16.msra.mxu0 %v2582_v26  ;;  %v696_v26 = vmul.f32 %v694_v3, %v690_v11 }
 0x290   : > { %1835 = vmatprep.subr.bf16.mxu0 %v2587_v29  ;;  %v746_v29 = vmul.f32 %v741_v13, %v737_v18 }
 0x293   : > { %1836 = vmatpush1.bf16.msra.mxu0 %v2585_v30  ;;  %v786_v30 = vsub.s32 5, %v3261_v51  ;;  %v815_v51 = vrot.slane %v3268_v57, %v814_v39 }
 0x294   : > { %1837 = vmatprep.subr.bf16.mxu0 %v2590_v31  ;;  %v764_v31 = vmul.f32 %v759_v15, %v3187_v27  ;;  %v752_v27 = vmul.f32 %v3253_v44, %v746_v29 }
 0x295   : > { %v787_v48 = vrot.slane %v3268_v57, %v786_v30  ;;  %v791_v54 = vrot.slane %v3270_v58, %v786_v30  ;;  %v771_v57 = vmul.f32 %v3255_v46, %v765_v40 }
 0x296   : > { %v770_v7 = vmul.f32 %v3255_v46, %v764_v31 }
 0x297   : > { %1838 = vmatpush1.bf16.msra.mxu0 %v2588_v32  ;;  %v697_v32 = vmul.f32 %v694_v3, %v691_v16  ;;  %v803_v3 = vpop.permute.xlu0 %802  ;;  %v792_v63 = vmul.f32 %v787_v48, %v779_v28  ;;  %v848_v16 = vmul.f32 %v843_v62, %v835_v6 }
 0x298   : > { %1839 = vmatprep.subr.bf16.mxu0 %v2593_v33  ;;  %v747_v33 = vmul.f32 %v745_v17, %v734_v22  ;;  %v807_v61 = vsel %vm806_vm5, %v803_v3, %v3266_v56  ;;  %v811_v1 = vsel %vm806_vm5, %v3266_v56, %v803_v3  ;;  %v2127_v17 = vld [vmem:[#allocation5 + $0x18] ss:$0 sm:$0xff] }
 0x299   : > { %v699_v52 = vadd.f32 %v697_v32, %v669_v41  ;;  %v820_v9 = vmul.f32 %v815_v51, %v807_v61  ;;  %v821_v11 = vmul.f32 %v819_v59, %v811_v1  ;;  %v798_v15 = vmul.f32 %v3257_v49, %v792_v63 }
 0x29a   : > { %v753_v53 = vmul.f32 %v3253_v44, %v747_v33  ;;  %v854_v24 = vmul.f32 %v3249_v38, %v848_v16 }
 0x29b   : > { %1840 = vmatpush1.bf16.msra.mxu0 %v2591_v34  ;;  %v668_v34 = vmul.f32 %v3245_v36, %v661_v19  ;;  %v727_v55 = vadd.f32 %v725_v43, %v699_v52  ;;  %v859_v8 = vpop.permute.xlu0 %858  ;;  %v827_v46 = vmul.f32 %v3247_v37, %v821_v11 }
 0x29c   : > { %v863_v56 = vsel %vm862_vm7, %v859_v8, %v861_v2 }
 0x29d   : > { %v698_v47 = vadd.f32 %v696_v26, %v668_v34  ;;  %v755_v4 = vadd.f32 %v753_v53, %v727_v55  ;;  %v876_v14 = vmul.f32 %v2126_v12, %v863_v56 }
 0x29e   : > { %1842 = vmatmul.mubr.bf16.vlgmr.msra.gmra.mrb[0].mxu0 %v1380_v35  ;;  %v724_v35 = vmul.f32 %v3251_v42, %v718_v20  ;;  %v783_v42 = vsel %vm778_vm4, %v777_v21, %v3259_v50  ;;  %v847_v50 = vrot.slane %v3270_v58, %v842_v45  ;;  %v867_v58 = vsel %vm862_vm7, %v861_v2, %v859_v8 }
 0x29f   : > { %v793_v5 = vmul.f32 %v791_v54, %v783_v42  ;;  %v773_v18 = vadd.f32 %v771_v57, %v755_v4  ;;  %v826_v21 = vmul.f32 %v3247_v37, %v820_v9  ;;  %v877_v22 = vmul.f32 %v2127_v17, %v867_v58 }
 0x2a0   : > { %v726_v36 = vadd.f32 %v724_v35, %v698_v47  ;;  %v849_v20 = vmul.f32 %v847_v50, %v839_v10  ;;  %v882_v30 = vmul.f32 %v3273_v60, %v876_v14 }
 0x2a1   : > { %v799_v19 = vmul.f32 %v3257_v49, %v793_v5  ;;  %v883_v32 = vmul.f32 %v3273_v60, %v877_v22 }
 0x2a2   : > { %v754_v44 = vadd.f32 %v752_v27, %v726_v36  ;;  %v855_v26 = vmul.f32 %v3249_v38, %v849_v20 }
 0x2a3   : > { %v801_v25 = vadd.f32 %v799_v19, %v773_v18 }
 0x2a4   : > { %v772_v13 = vadd.f32 %v770_v7, %v754_v44 }
 0x2a5   : > { %v829_v31 = vadd.f32 %v827_v46, %v801_v25 }
 0x2a6   : > { %v800_v23 = vadd.f32 %v798_v15, %v772_v13 }
 0x2a7   : > { %v857_v33 = vadd.f32 %v855_v26, %v829_v31 }
 0x2a8   : > { %v828_v29 = vadd.f32 %v826_v21, %v800_v23 }
 0x2a9   : > { %v885_v35 = vadd.f32 %v883_v32, %v857_v33 }
 0x2aa   : > { %v856_v49 = vadd.f32 %v854_v24, %v828_v29 }
 0x2ab   : > { %v1858_v39 = vsel %vm1850_vm8, %v885_v35, 0.0 }
 0x2ac   : > { %v884_v34 = vadd.f32 %v882_v30, %v856_v49  ;;  %v1859_v40 = vrot.slane %v1858_v39, 4 }
 0x2ae   : > { %v1851_v37 = vsel %vm1850_vm8, %v884_v34, 0.0  ;;  %v1860_v43 = vadd.f32 %v1859_v40, %v1858_v39 }
 0x2af   : > { %v1852_v0 = vrot.slane %v1851_v37, 4 }
 0x2b0   : > { %v1861_v3 = vrot.slane %v1860_v43, 2 }
 0x2b1   : > { %v1853_v41 = vadd.f32 %v1852_v0, %v1851_v37 }
 0x2b2   : > { %v1862_v42 = vadd.f32 %v1861_v3, %v1860_v43 }
 0x2b3   : > { %v1854_v45 = vrot.slane %v1853_v41, 2 }
 0x2b4   : > { %v1863_v44 = vrot.slane %v1862_v42, 1 }
 0x2b5   : > { %v1855_v28 = vadd.f32 %v1854_v45, %v1853_v41 }
 0x2b6   : > { %v1864_v50 = vadd.f32 %v1863_v44, %v1862_v42 }
 0x2b7   : > { %v1856_v61 = vrot.slane %v1855_v28, 1 }
 0x2b9   : > { %v1857_v4 = vadd.f32 %v1856_v61, %v1855_v28 }
 0x371   : > { %v1843_v38 = vpop.f32.mrb[0].mxu0 }
 0x372   : > { %v1865_v47 = vsel %vm1850_vm8, %v1843_v38, 0.0  ;;  %v1845_v27 = vpop.f32.mrb[1].mxu0 }
 0x373   : > { %v1866_v60 = vrot.slane %v1865_v47, 4  ;;  %v1872_v48 = vsel %vm1850_vm8, %v1845_v27, 0.0  ;;  %v1847_v52 = vpop.f32.mrb[2].mxu0 }
 0x374   : > { %v1873_v53 = vrot.slane %v1872_v48, 4  ;;  %v1848_v54 = vpop.f32.mrb[3].mxu0 }
 0x375   : > { %v1867_v36 = vadd.f32 %v1866_v60, %v1865_v47  ;;  %v1951_v54 = vpop.permute.xlu1 %1950 }
 0x376   : > { %v1874_v51 = vadd.f32 %v1873_v53, %v1872_v48  ;;  %v1933_v53 = vpop.permute.xlu0 %1932 }
 0x377   : > { %v1868_v55 = vrot.slane %v1867_v36, 2 }
 0x378   : > { %v1875_v59 = vrot.slane %v1874_v51, 2 }
 0x379   : > { %v1869_v62 = vadd.f32 %v1868_v55, %v1867_v36 }
 0x37a   : > { %v1876_v63 = vadd.f32 %v1875_v59, %v1874_v51 }
 0x37b   : > { %v1870_v1 = vrot.slane %v1869_v62, 1 }
 0x37c   : > { %v1877_v2 = vrot.slane %v1876_v63, 1 }
 0x37d   : > { %v1871_v5 = vadd.f32 %v1870_v1, %v1869_v62  ;;  %v1959_v1 = vpop.permute.xlu0 %1958 }
 0x37e   : > { %v1878_v6 = vadd.f32 %v1877_v2, %v1876_v63  ;;  %v1941_v2 = vpop.permute.xlu1 %1940 }
 0x37f   : > { %v1879_v7 = vadd.f32 %v1871_v5, %v1857_v4 }
 0x380   : > { %v1880_v8 = vadd.f32 %v1878_v6, %v1864_v50 }
 0x381   : > { %v1881_v9 = vmul.f32 0.125, %v1879_v7 }
 0x382   : > { %v1882_v10 = vmul.f32 0.125, %v1880_v8 }
 0x383   : > { %v1901_v57 = vsub.f32 %v1843_v38, %v1881_v9  ;;  %v1883_v11 = vsub.f32 %v884_v34, %v1881_v9 }
 0x384   : > { %v1902_v12 = vsub.f32 %v1845_v27, %v1882_v10  ;;  %v1884_v56 = vsub.f32 %v885_v35, %v1882_v10 }
 0x385   : > { %v1903_v13 = vmul.f32 %v1901_v57, %v1901_v57  ;;  %v1885_v15 = vmul.f32 %v1883_v11, %v1883_v11 }
 0x386   : > { %v1904_v16 = vmul.f32 %v1902_v12, %v1902_v12  ;;  %v1886_v17 = vmul.f32 %v1884_v56, %v1884_v56 }
 0x387   : > { %v1905_v58 = vsel %vm1850_vm8, %v1903_v13, 0.0  ;;  %v1887_v18 = vsel %vm1850_vm8, %v1885_v15, 0.0 }
 0x388   : > { %v1906_v19 = vrot.slane %v1905_v58, 4  ;;  %v1912_v20 = vsel %vm1850_vm8, %v1904_v16, 0.0  ;;  %v1888_v21 = vrot.slane %v1887_v18, 4  ;;  %v1894_v14 = vsel %vm1850_vm8, %v1886_v17, 0.0 }
 0x389   : > { %v1913_v46 = vrot.slane %v1912_v20, 4  ;;  %v1895_v22 = vrot.slane %v1894_v14, 4 }
 0x38a   : > { %v1907_v23 = vadd.f32 %v1906_v19, %v1905_v58  ;;  %v1889_v24 = vadd.f32 %v1888_v21, %v1887_v18 }
 0x38b   : > { %v1914_v25 = vadd.f32 %v1913_v46, %v1912_v20  ;;  %v1896_v26 = vadd.f32 %v1895_v22, %v1894_v14 }
 0x38c   : > { %v1908_v29 = vrot.slane %v1907_v23, 2  ;;  %v1890_v30 = vrot.slane %v1889_v24, 2 }
 0x38d   : > { %v1915_v31 = vrot.slane %v1914_v25, 2  ;;  %v1897_v32 = vrot.slane %v1896_v26, 2 }
 0x38e   : > { %v1909_v49 = vadd.f32 %v1908_v29, %v1907_v23  ;;  %v1891_v33 = vadd.f32 %v1890_v30, %v1889_v24 }
 0x38f   : > { %v1916_v34 = vadd.f32 %v1915_v31, %v1914_v25  ;;  %v1898_v35 = vadd.f32 %v1897_v32, %v1896_v26 }
 0x390   : > { %v1910_v37 = vrot.slane %v1909_v49, 1  ;;  %v1892_v39 = vrot.slane %v1891_v33, 1 }
 0x391   : > { %v1917_v0 = vrot.slane %v1916_v34, 1  ;;  %v1899_v40 = vrot.slane %v1898_v35, 1 }
 0x392   : > { %v1911_v41 = vadd.f32 %v1910_v37, %v1909_v49  ;;  %v1893_v43 = vadd.f32 %v1892_v39, %v1891_v33 }
 0x393   : > { %v1918_v38 = vadd.f32 %v1917_v0, %v1916_v34  ;;  %v1900_v45 = vadd.f32 %v1899_v40, %v1898_v35 }
 0x394   : > { %v1919_v47 = vadd.f32 %v1911_v41, %v1893_v43 }
 0x395   : > { %v1920_v27 = vadd.f32 %v1918_v38, %v1900_v45 }
 0x396   : > { %v1921_v3 = vmul.f32 0.125, %v1919_v47 }
 0x397   : > { %v1922_v60 = vmul.f32 0.125, %v1920_v27 }
 0x398   : > { %v1923_v48 = vadd.f32 1e-06, %v1921_v3 }
 0x399   : > { %v1924_v52 = vadd.f32 1e-06, %v1922_v60 }
 0x39a   : > { %2598 = vrsqrt.f32 %v1923_v48 }
 0x39b   : > { %2600 = vrsqrt.f32 %v1924_v52 }
 0x3a4   : > { %v2599_v28 = vpop.eup %2598 }
 0x3a5   : > { %v2601_v36 = vpop.eup %2600  ;;  %v1928_v42 = vmul.f32 %v2599_v28, %v1883_v11  ;;  %v1946_v51 = vmul.f32 %v2599_v28, %v1901_v57 }
 0x3a6   : > { %v1929_v55 = vmul.f32 %v2601_v36, %v1884_v56  ;;  %v1947_v59 = vmul.f32 %v2601_v36, %v1902_v12 }
 0x3a7   : > { %v1935_v61 = vmul.f32 %v1933_v53, %v1928_v42  ;;  %v1953_v62 = vmul.f32 %v1951_v54, %v1946_v51 }
 0x3a8   : > { %v1936_v44 = vmul.f32 %v1933_v53, %v1929_v55  ;;  %v1954_v63 = vmul.f32 %v1951_v54, %v1947_v59 }
 0x3a9   : > { %v1961_v4 = vadd.f32 %v1959_v1, %v1953_v62  ;;  %v1943_v5 = vadd.f32 %v1941_v2, %v1935_v61 }
 0x3aa   : > { %v1962_v50 = vadd.f32 %v1959_v1, %v1954_v63  ;;  %v1944_v6 = vadd.f32 %v1941_v2, %v1936_v44 }
 0x3ac   : > { %v1970_v7 = vcombine.low %v1961_v4, %v1962_v50  ;;  %v1965_v8 = vcombine.low %v1943_v5, %v1944_v6 }
 0x3ae   : > { %1972 = vst [vmem:[%s573_s23 + $0x8] sm:$0xff] %v1970_v7  ;;  %1967 = vst [vmem:[%s573_s23] sm:$0xff] %v1965_v8 }
 0x3af   : > { %2783 = shalt.err (!%p2780_p9)
}
 0x3b0   : > { %s2784_s21 = scalar_lea.hbm %s3342_s17, 256  ;;  %s2788_s20 = scalar_lea.hbm %s3444_s29, 512 }
 0x3b1   : > { %p2785_p10 = scmp.ne.s32.totalorder %s3342_s17, %s2784_s21  ;;  %p2789_p1 = scmp.lt.u32.totalorder %s3342_s17, %s3444_s29 }
 0x3b2   : > { %p2790_p2 = scmp.lt.u32.totalorder %s2788_s20, %s2784_s21  ;;  %p2792_p4 = scmp.lt.u32.totalorder %s2784_s21, %s3342_s17 }
 0x3b3   : > { %p2786_p13 = pnand %p2785_p10, %p3445_p7 }
 0x3b4   : > { %p2791_p3 = por %p2790_p2, %p2789_p1 }
 0x3b5   : > { %p2787_p12 = pneg %p2786_p13 }
 0x3b6   : > { %p2793_p8 = por %p2792_p4, %p2791_p3 }
 0x3b8   : > { %p2794_p11 = pnand %p2793_p8, %p2787_p12 }
 0x3ba   : > { %2797 = shalt.err (!%p2794_p11)
}
 0x3bb   : > { %2291 = dma.vmem_to_hbm [thread:$0]  (%p3445_p7), %s3344_s16, 256, %s3342_s17, %s1974_s9  }
 0x3bc PF: > { %s3446_s30 = sld [smem:[#allocation22_spill]]  ;;  %s3447_s23 = sld [smem:[#allocation19_spill]] }
 0x3bd   : > { %s3448_s10 = sld [smem:[#allocation26_spill]] }
 0x3c2   : > { %p2328_p5 = scmp.ge.s32.totalorder %s3446_s30, 2  ;;  %s2000_s28 = sand.u32 1, %s3447_s23  }
 0x3c3   : > { %p3449_p0 = scmp.ne.s32.totalorder %s3448_s10, 0  ;;  %s2001_s22 = scalar_lea.sflag [#allocation4], %s2000_s28 }
 0x3c5   : > { %p2313_p6 = pnand %p2328_p5, %p3449_p0 }
 0x3c7   : > { %2831 = dma.done.wait (!%p2313_p6), %s2001_s22, 256  }
 0x3c8   : > { %2833 = vsyncadd (!%p2313_p6), %s2001_s22, 4294967040  ;;  %s3450_s21 = sld [smem:[#allocation23_spill]]  ;;  %s3451_s18 = sld [smem:[#allocation20_spill]] }
 0x3c9   : > { %s3452_s19 = sld [smem:[#allocation21_spill]]  ;;  %s3453_s20 = sld [smem:[#allocation24_spill]] }
 0x3ce   : > { %p29_p9 = scmp.ge.s32.totalorder %s3450_s21, 4  }
 0x3d0   :  { %31 = sbr.rel (!%p29_p9) target bundleno = 12 (0xc), region = 140 }
 0x3d7   :  { %2006 = vsyncpa [#allocation3], 1 }
 0x3d8   :  { %2008 = vsyncpa [#allocation3 + $0x1], 1 }
 0x3d9   :  { %2009 = vsyncpa [#allocation6], 1 }
 0x3da   :  { %2010 = vsyncpa [#allocation9], 1 }
 0x3db   :  { %2011 = vsyncpa [#allocation12], 1 }
 0x3dc   :  { %2012 = vsyncpa [#allocation4], 1 }
 0x3dd   :  { %2014 = vsyncpa [#allocation4 + $0x1], 1 }

</bundles_post_ra>
